<compile_context>
chip_gen: v7x
topology: tpu7x:2x2x1
jax: 0.10.0
libtpu: 0.0.40
codegen_flags: <defaults>
</compile_context>

<pallas_src>
import functools

import jax
import jax.numpy as jnp
import numpy as np
from jax.experimental import pallas as pl
from jax.experimental.pallas import tpu as pltpu

BN_EPS = 1e-5
LANE = 128
VMEM_LIMIT = 48 * 1024 * 1024  # conservative for v7x (64 MiB/TC), roomy on v5e/v6e


def _ru(x, m):
    return (x + m - 1) // m * m


# --------------------------- Pallas kernels ----------------------------------

def _stage1_kernel(x_ref, w_ref, yl_ref, yr_ref, st_ref, *, cout_p):
    """Fused convl1 & convr1 (1x1, stride 2) matmul -> bf16 activations,
    per-tile f32 BN partial statistics (reduced outside the kernel)."""
    y = jnp.dot(x_ref[...], w_ref[...], preferred_element_type=jnp.float32)
    yl_ref[...] = y[:, :cout_p].astype(yl_ref.dtype)      # pre-BN left branch
    yr_ref[...] = y[:, cout_p:].astype(yr_ref.dtype)      # pre-BN right branch
    # two separate row stores (no concatenate -> no per-step XLU relayout)
    st_ref[0, 0:1, :] = jnp.sum(y, axis=0, keepdims=True)
    st_ref[0, 1:2, :] = jnp.sum(y * y, axis=0, keepdims=True)


def _stage2_kernel(yr_ref, w2_ref, sc_ref, sh_ref, y2_ref, st_ref,
                   pad_ref, acc_ref, *, ho, wo):
    """BN+ReLU of convr1 fused with the 3x3 conv (9 accumulated matmuls) + stats.

    yr arrives and y2 leaves in the flat [rows, C] layout stages 1/3 use; the
    zero-padded halo plane exists only in VMEM scratch (no HBM round-trip)."""
    c = acc_ref.shape[-1]
    x = yr_ref[...].astype(jnp.float32)                       # (ho*wo, c)
    r1 = jnp.maximum(x * sc_ref[...] + sh_ref[...], 0.0)
    # conv zero-padding applies to the post-BN/ReLU map -> zero halo plane,
    # write the interior once (single hoisted f32->bf16 cast)
    pad_ref[...] = jnp.zeros_like(pad_ref)
    pad_ref[pl.ds(1, ho), pl.ds(1, wo), :] = (
        r1.astype(pad_ref.dtype).reshape(ho, wo, c))

    acc_ref[...] = jnp.zeros_like(acc_ref)
    # TODO(synk): on v6e/v7x (256-deep MXU) adjacent taps could be paired along
    # K (K=256 per matmul) for better MXU utilization; kept K=128-per-tap here.
    for kx in range(3):
        slab = pad_ref[:, pl.ds(kx, wo), :]                   # 1 shifted load / kx
        for ky in range(3):
            win = slab[ky:ky + ho].reshape(ho * wo, c)        # H slice: relayout-free
            acc_ref[...] += jnp.dot(win, w2_ref[ky, kx],
                                    preferred_element_type=jnp.float32)

    acc = acc_ref[...]
    y2_ref[...] = acc.astype(y2_ref.dtype)
    st_ref[0, 0:1, :] = jnp.sum(acc, axis=0, keepdims=True)
    st_ref[0, 1:2, :] = jnp.sum(acc * acc, axis=0, keepdims=True)


def _stage3_kernel(yl_ref, y2_ref, w3_ref, sl_ref, tl_ref, s2_ref, t2_ref, out_ref):
    """BN+ReLU of convr2, 1x1 convr3, BN of left branch, residual add + ReLU."""
    r2 = jnp.maximum(y2_ref[...].astype(jnp.float32) * s2_ref[...] + t2_ref[...], 0.0)
    rx = jnp.dot(r2.astype(jnp.bfloat16), w3_ref[...],
                 preferred_element_type=jnp.float32)
    lx = yl_ref[...].astype(jnp.float32) * sl_ref[...] + tl_ref[...]
    out_ref[...] = jnp.maximum(lx + rx, 0.0)


# ------------------------------- wrapper --------------------------------------

def conv_block_forward(x_nchw, params):
    N, Cin, H, W = x_nchw.shape
    Cout = params["wl1"].shape[1]
    Cmid = params["wr1"].shape[1]
    Ho, Wo = (H - 1) // 2 + 1, (W - 1) // 2 + 1
    M = N * Ho * Wo
    MI = Ho * Wo                                   # rows per image

    cin_p, cmid_p, cout_p = _ru(Cin, LANE), _ru(Cmid, LANE), _ru(Cout, LANE)
    ctot_p = cout_p + cmid_p
    tm = min(1024, _ru(M, 8))                      # M-tile (rows), multiple of 8
    m_pad = _ru(M, tm)
    n_mt = m_pad // tm

    f32, bf16 = jnp.float32, jnp.bfloat16

    # -------- host-side layout prep (one fused slice/pad/cast) --------
    # TODO(synk): the stride-2 sampling could be pulled into stage 1 via an
    # (N, Ho)-tiled grid + in-kernel strided W slice; kept as one XLA op here.
    x_nhwc = jnp.transpose(x_nchw, (0, 2, 3, 1))
    xs = x_nhwc[:, ::2, ::2, :].reshape(M, Cin)
    xs = jnp.pad(xs, ((0, m_pad - M), (0, cin_p - Cin))).astype(bf16)

    def pad2(w, r, c):
        return jnp.pad(w, ((0, r - w.shape[0]), (0, c - w.shape[1])))

    w1cat = jnp.concatenate(
        [pad2(params["wl1"], cin_p, cout_p), pad2(params["wr1"], cin_p, cmid_p)],
        axis=1).astype(bf16)
    w2p = jnp.pad(params["wr2"],
                  ((0, 0), (0, 0), (0, cmid_p - Cmid), (0, cmid_p - Cmid))).astype(bf16)
    w3p = pad2(params["wr3"], cmid_p, cout_p).astype(bf16)

    def pad_g(g, c):  # gamma padded with 1 (keeps padded lanes finite & zero)
        return jnp.pad(g, ((0, 0), (0, c - g.shape[1])), constant_values=1.0).astype(f32)

    def pad_b(b, c):  # beta padded with 0
        return jnp.pad(b, ((0, 0), (0, c - b.shape[1]))).astype(f32)

    gl1, bl1 = pad_g(params["gl1"], cout_p), pad_b(params["bl1"], cout_p)
    gr1, br1 = pad_g(params["gr1"], cmid_p), pad_b(params["br1"], cmid_p)
    gr2, br2 = pad_g(params["gr2"], cmid_p), pad_b(params["br2"], cmid_p)

    # -------- stage 1: fused 1x1/stride-2 convs (bf16 out) + per-tile BN stats ----
    yl_pre, yr_pre, st1_parts = pl.pallas_call(
        functools.partial(_stage1_kernel, cout_p=cout_p),
        grid=(n_mt,),
        in_specs=[pl.BlockSpec((tm, cin_p), lambda i: (i, 0)),
                  pl.BlockSpec((cin_p, ctot_p), lambda i: (0, 0))],
        out_specs=(pl.BlockSpec((tm, cout_p), lambda i: (i, 0)),
                   pl.BlockSpec((tm, cmid_p), lambda i: (i, 0)),
                   pl.BlockSpec((1, 2, ctot_p), lambda i: (i, 0, 0))),
        out_shape=(jax.ShapeDtypeStruct((m_pad, cout_p), bf16),
                   jax.ShapeDtypeStruct((m_pad, cmid_p), bf16),
                   jax.ShapeDtypeStruct((n_mt, 2, ctot_p), f32)),
        compiler_params=pltpu.CompilerParams(
            dimension_semantics=("parallel",),       # per-tile stats -> no serialization
            vmem_limit_bytes=VMEM_LIMIT),
        cost_estimate=pl.CostEstimate(
            flops=2 * m_pad * cin_p * ctot_p,
            transcendentals=0,
            bytes_accessed=2 * m_pad * cin_p + 2 * cin_p * ctot_p
                           + 2 * m_pad * ctot_p + 4 * 2 * n_mt * ctot_p),
    )(xs, w1cat)

    st1 = jnp.sum(st1_parts, axis=0)                 # tiny XLA reduce of partials

    def bn_coeffs(st, g, b, count):
        mean = st[0] / count
        var = jnp.maximum(st[1] / count - mean * mean, 0.0)   # biased variance
        scale = g[0] * jax.lax.rsqrt(var + BN_EPS)
        shift = b[0] - mean * scale
        return scale.reshape(1, -1), shift.reshape(1, -1)

    sl, tl = bn_coeffs(st1[:, :cout_p], gl1, bl1, M)
    sr, tr = bn_coeffs(st1[:, cout_p:], gr1, br1, M)

    # -------- stage 2: in-kernel BN+ReLU + VMEM halo + 3x3 conv -------------------
    y2, st2_parts = pl.pallas_call(
        functools.partial(_stage2_kernel, ho=Ho, wo=Wo),
        grid=(N,),
        in_specs=[pl.BlockSpec((MI, cmid_p), lambda n: (n, 0)),
                  pl.BlockSpec((3, 3, cmid_p, cmid_p), lambda n: (0, 0, 0, 0)),
                  pl.BlockSpec((1, cmid_p), lambda n: (0, 0)),
                  pl.BlockSpec((1, cmid_p), lambda n: (0, 0))],
        out_specs=(pl.BlockSpec((MI, cmid_p), lambda n: (n, 0)),
                   pl.BlockSpec((1, 2, cmid_p), lambda n: (n, 0, 0))),
        out_shape=(jax.ShapeDtypeStruct((m_pad, cmid_p), bf16),
                   jax.ShapeDtypeStruct((N, 2, cmid_p), f32)),
        scratch_shapes=[pltpu.VMEM((Ho + 2, Wo + 2, cmid_p), bf16),
                        pltpu.VMEM((MI, cmid_p), f32)],
        compiler_params=pltpu.CompilerParams(
            dimension_semantics=("parallel",),
            vmem_limit_bytes=VMEM_LIMIT),
        cost_estimate=pl.CostEstimate(
            flops=2 * M * 9 * cmid_p * cmid_p,
            transcendentals=0,
            bytes_accessed=2 * M * cmid_p + 2 * 9 * cmid_p * cmid_p
                           + 2 * M * cmid_p + 4 * 2 * N * cmid_p),
    )(yr_pre, w2p, sr, tr)

    st2 = jnp.sum(st2_parts, axis=0)
    s2c, t2c = bn_coeffs(st2, gr2, br2, M)

    # -------- stage 3: BN+ReLU, convr3, residual add + ReLU -----------------------
    out_p = pl.pallas_call(
        _stage3_kernel,
        grid=(n_mt,),
        in_specs=[pl.BlockSpec((tm, cout_p), lambda i: (i, 0)),
                  pl.BlockSpec((tm, cmid_p), lambda i: (i, 0)),
                  pl.BlockSpec((cmid_p, cout_p), lambda i: (0, 0)),
                  pl.BlockSpec((1, cout_p), lambda i: (0, 0)),
                  pl.BlockSpec((1, cout_p), lambda i: (0, 0)),
                  pl.BlockSpec((1, cmid_p), lambda i: (0, 0)),
                  pl.BlockSpec((1, cmid_p), lambda i: (0, 0))],
        out_specs=pl.BlockSpec((tm, cout_p), lambda i: (i, 0)),
        out_shape=jax.ShapeDtypeStruct((m_pad, cout_p), f32),
        compiler_params=pltpu.CompilerParams(
            dimension_semantics=("parallel",),       # independent M tiles
            vmem_limit_bytes=VMEM_LIMIT),
        cost_estimate=pl.CostEstimate(
            flops=2 * m_pad * cmid_p * cout_p,
            transcendentals=0,
            bytes_accessed=2 * m_pad * (cmid_p + cout_p) + 2 * cmid_p * cout_p
                           + 4 * m_pad * cout_p),
    )(yl_pre, y2, w3p, sl, tl, s2c, t2c)

    out = out_p[:M, :Cout].reshape(N, Ho, Wo, Cout)
    return jnp.transpose(out, (0, 3, 1, 2))          # back to NCHW (module semantics)


# ------------------------- pure-JAX reference ---------------------------------

def conv_block_reference(x_nchw, params):
    x = jnp.transpose(x_nchw, (0, 2, 3, 1))

    def conv2d(x, w_hwio, stride, pad):
        return jax.lax.conv_general_dilated(
            x, w_hwio, window_strides=(stride, stride),
            padding=[(pad, pad), (pad, pad)],
            dimension_numbers=('NHWC', 'HWIO', 'NHWC'),
            precision=jax.lax.Precision.HIGHEST)

    def bn(y, g, b):
        mu = jnp.mean(y, axis=(0, 1, 2), keepdims=True)
        var = jnp.mean((y - mu) ** 2, axis=(0, 1, 2), keepdims=True)
        return (y - mu) * jax.lax.rsqrt(var + BN_EPS) * g.reshape(1, 1, 1, -1) + b.reshape(1, 1, 1, -1)

    lx = bn(conv2d(x, params["wl1"][None, None], 2, 0), params["gl1"], params["bl1"])
    r = jnp.maximum(bn(conv2d(x, params["wr1"][None, None], 2, 0),
                       params["gr1"], params["br1"]), 0.0)
    r = jnp.maximum(bn(conv2d(r, params["wr2"], 1, 1),
                       params["gr2"], params["br2"]), 0.0)
    r = conv2d(r, params["wr3"][None, None], 1, 0)
    out = jnp.maximum(lx + r, 0.0)
    return jnp.transpose(out, (0, 3, 1, 2))


# --------------------------------- main ----------------------------------------

if __name__ == "__main__":
    N, Cin, H, W = 2, 4, 16, 16
    Cout = 8
    Cmid = Cin  # ConvBlock: mid_channels = in_channels

    key = jax.random.PRNGKey(0)
    ks = jax.random.split(key, 12)
    params = {
        # conv weights (1x1 as [Cin, Cout], 3x3 as HWIO)
        "wl1": 0.1 * jax.random.normal(ks[0], (Cin, Cout), jnp.float32),
        "wr1": 0.1 * jax.random.normal(ks[1], (Cin, Cmid), jnp.float32),
        "wr2": 0.1 * jax.random.normal(ks[2], (3, 3, Cmid, Cmid), jnp.float32),
        "wr3": 0.1 * jax.random.normal(ks[3], (Cmid, Cout), jnp.float32),
        # BatchNorm affine params (gamma, beta)
        "gl1": 1.0 + 0.1 * jax.random.normal(ks[4], (1, Cout), jnp.float32),
        "bl1": 0.1 * jax.random.normal(ks[5], (1, Cout), jnp.float32),
        "gr1": 1.0 + 0.1 * jax.random.normal(ks[6], (1, Cmid), jnp.float32),
        "br1": 0.1 * jax.random.normal(ks[7], (1, Cmid), jnp.float32),
        "gr2": 1.0 + 0.1 * jax.random.normal(ks[8], (1, Cmid), jnp.float32),
        "br2": 0.1 * jax.random.normal(ks[9], (1, Cmid), jnp.float32),
    }
    x = jax.random.normal(ks[10], (N, Cin, H, W), jnp.float32)

    out = jax.block_until_ready(jax.jit(conv_block_forward)(x, params))
    ref = jax.block_until_ready(conv_block_reference(x, params))

    # bf16 MXU inputs + bf16 inter-stage activations vs f32 HIGHEST reference
    np.testing.assert_allclose(np.asarray(out), np.asarray(ref), rtol=3e-2, atol=3e-2)

    print("KERNEL_OK")
</pallas_src>

<mosaic_0001>
module attributes {stable_mosaic.version = 11 : i64} {
  func.func @_stage1_kernel(%arg0: i32, %arg1: memref<128x128xbf16, #tpu.memory_space<vmem>>, %arg2: memref<128x256xbf16, #tpu.memory_space<vmem>>, %arg3: memref<128x128xbf16, #tpu.memory_space<vmem>>, %arg4: memref<128x128xbf16, #tpu.memory_space<vmem>>, %arg5: memref<1x2x256xf32, #tpu.memory_space<vmem>>) attributes {dimension_semantics = [#tpu.dimension_semantics<parallel>], iteration_bounds = array<i64: 1>, scalar_prefetch = 0 : i64, scratch_operands = 0 : i64, tpu.core_type = #tpu.core_type<tc>, window_params = [{transform_indices = @transform_0, window_bounds = array<i64: 128, 128>}, {pipeline_mode = #tpu.pipeline_mode<synchronous>, transform_indices = @transform_1, window_bounds = array<i64: 128, 256>}, {transform_indices = @transform_2, window_bounds = array<i64: 128, 128>}, {transform_indices = @transform_3, window_bounds = array<i64: 128, 128>}, {transform_indices = @transform_4, window_bounds = array<i64: 1, 2, 256>}]} {
    %c0 = arith.constant 0 : index
    %c0_0 = arith.constant 0 : index
    %0 = vector.load %arg1[%c0, %c0_0] : memref<128x128xbf16, #tpu.memory_space<vmem>>, vector<128x128xbf16>
    %c0_1 = arith.constant 0 : index
    %c0_2 = arith.constant 0 : index
    %1 = vector.load %arg2[%c0_1, %c0_2] : memref<128x256xbf16, #tpu.memory_space<vmem>>, vector<128x256xbf16>
    %cst = arith.constant dense<0.000000e+00> : vector<128x256xf32>
    %2 = tpu.matmul %0, %1, %cst {dimension_numbers = #tpu.dot_dimension_numbers<[1], [0], [0], [1], [0, 0, 1, 1], [], []>} : vector<128x128xbf16>, vector<128x256xbf16>, vector<128x256xf32> -> vector<128x256xf32>
    %3 = vector.extract_strided_slice %2 {offsets = [0, 0], sizes = [128, 128], strides = [1, 1]} : vector<128x256xf32> to vector<128x128xf32>
    %4 = arith.truncf %3 : vector<128x128xf32> to vector<128x128xbf16>
    %c0_3 = arith.constant 0 : index
    %c0_4 = arith.constant 0 : index
    %5 = vector.load %arg3[%c0_3, %c0_4] : memref<128x128xbf16, #tpu.memory_space<vmem>>, vector<128x128xbf16>
    tpu.vector_store %arg3[%c0_3, %c0_4], %4 {strides = array<i32>} : memref<128x128xbf16, #tpu.memory_space<vmem>>, vector<128x128xbf16>,
    %6 = vector.extract_strided_slice %2 {offsets = [0, 128], sizes = [128, 128], strides = [1, 1]} : vector<128x256xf32> to vector<128x128xf32>
    %7 = arith.truncf %6 : vector<128x128xf32> to vector<128x128xbf16>
    %c0_5 = arith.constant 0 : index
    %c0_6 = arith.constant 0 : index
    %8 = vector.load %arg4[%c0_5, %c0_6] : memref<128x128xbf16, #tpu.memory_space<vmem>>, vector<128x128xbf16>
    tpu.vector_store %arg4[%c0_5, %c0_6], %7 {strides = array<i32>} : memref<128x128xbf16, #tpu.memory_space<vmem>>, vector<128x128xbf16>,
    %cst_7 = arith.constant dense<0.000000e+00> : vector<256xf32>
    %9 = vector.multi_reduction <add>, %2, %cst_7 [0] : vector<128x256xf32> to vector<256xf32>
    %10 = vector.shape_cast %9 : vector<256xf32> to vector<1x256xf32>
    %c0_8 = arith.constant 0 : index
    %c0_9 = arith.constant 0 : index
    %c0_10 = arith.constant 0 : index
    %11 = vector.load %arg5[%c0_8, %c0_9, %c0_10] : memref<1x2x256xf32, #tpu.memory_space<vmem>>, vector<1x1x256xf32>
    %12 = vector.shape_cast %11 : vector<1x1x256xf32> to vector<1x256xf32>
    %13 = vector.shape_cast %10 : vector<1x256xf32> to vector<1x1x256xf32>
    tpu.vector_store %arg5[%c0_8, %c0_9, %c0_10], %13 {strides = array<i32>} : memref<1x2x256xf32, #tpu.memory_space<vmem>>, vector<1x1x256xf32>,
    %14 = arith.mulf %2, %2 : vector<128x256xf32>
    %cst_11 = arith.constant dense<0.000000e+00> : vector<256xf32>
    %15 = vector.multi_reduction <add>, %14, %cst_11 [0] : vector<128x256xf32> to vector<256xf32>
    %16 = vector.shape_cast %15 : vector<256xf32> to vector<1x256xf32>
    %c0_12 = arith.constant 0 : index
    %c1 = arith.constant 1 : index
    %c0_13 = arith.constant 0 : index
    %17 = vector.load %arg5[%c0_12, %c1, %c0_13] : memref<1x2x256xf32, #tpu.memory_space<vmem>>, vector<1x1x256xf32>
    %18 = vector.shape_cast %17 : vector<1x1x256xf32> to vector<1x256xf32>
    %19 = vector.shape_cast %16 : vector<1x256xf32> to vector<1x1x256xf32>
    tpu.vector_store %arg5[%c0_12, %c1, %c0_13], %19 {strides = array<i32>} : memref<1x2x256xf32, #tpu.memory_space<vmem>>, vector<1x1x256xf32>,
    return
  }
  func.func @transform_0(%arg0: i32) -> (i32, i32) {
    %c0_i32 = arith.constant 0 : i32
    %c0_i32_0 = arith.constant 0 : i32
    return %arg0, %c0_i32 : i32, i32
  }
  func.func @transform_1(%arg0: i32) -> (i32, i32) {
    %c0_i32 = arith.constant 0 : i32
    %c0_i32_0 = arith.constant 0 : i32
    %c0_i32_1 = arith.constant 0 : i32
    return %c0_i32, %c0_i32_0 : i32, i32
  }
  func.func @transform_2(%arg0: i32) -> (i32, i32) {
    %c0_i32 = arith.constant 0 : i32
    %c0_i32_0 = arith.constant 0 : i32
    return %arg0, %c0_i32 : i32, i32
  }
  func.func @transform_3(%arg0: i32) -> (i32, i32) {
    %c0_i32 = arith.constant 0 : i32
    %c0_i32_0 = arith.constant 0 : i32
    return %arg0, %c0_i32 : i32, i32
  }
  func.func @transform_4(%arg0: i32) -> (i32, i32, i32) {
    %c0_i32 = arith.constant 0 : i32
    %c0_i32_0 = arith.constant 0 : i32
    %c0_i32_1 = arith.constant 0 : i32
    return %arg0, %c0_i32, %c0_i32_0 : i32, i32, i32
  }
}

module attributes {stable_mosaic.version = 11 : i64} {
  func.func @_stage2_kernel(%arg0: i32, %arg1: memref<64x128xbf16, #tpu.memory_space<vmem>>, %arg2: memref<3x3x128x128xbf16, #tpu.memory_space<vmem>>, %arg3: memref<1x128xf32, #tpu.memory_space<vmem>>, %arg4: memref<1x128xf32, #tpu.memory_space<vmem>>, %arg5: memref<64x128xbf16, #tpu.memory_space<vmem>>, %arg6: memref<1x2x128xf32, #tpu.memory_space<vmem>>, %arg7: memref<10x10x128xbf16, #tpu.memory_space<vmem>>, %arg8: memref<64x128xf32, #tpu.memory_space<vmem>>) attributes {dimension_semantics = [#tpu.dimension_semantics<parallel>], iteration_bounds = array<i64: 2>, scalar_prefetch = 0 : i64, scratch_operands = 2 : i64, tpu.core_type = #tpu.core_type<tc>, window_params = [{transform_indices = @transform_0, window_bounds = array<i64: 64, 128>}, {pipeline_mode = #tpu.pipeline_mode<synchronous>, transform_indices = @transform_1, window_bounds = array<i64: 3, 3, 128, 128>}, {pipeline_mode = #tpu.pipeline_mode<synchronous>, transform_indices = @transform_2, window_bounds = array<i64: 1, 128>}, {pipeline_mode = #tpu.pipeline_mode<synchronous>, transform_indices = @transform_3, window_bounds = array<i64: 1, 128>}, {transform_indices = @transform_4, window_bounds = array<i64: 64, 128>}, {transform_indices = @transform_5, window_bounds = array<i64: 1, 2, 128>}]} {
    %c0 = arith.constant 0 : index
    %c0_0 = arith.constant 0 : index
    %0 = vector.load %arg1[%c0, %c0_0] : memref<64x128xbf16, #tpu.memory_space<vmem>>, vector<64x128xbf16>
    %1 = arith.extf %0 : vector<64x128xbf16> to vector<64x128xf32>
    %c0_1 = arith.constant 0 : index
    %c0_2 = arith.constant 0 : index
    %2 = vector.load %arg3[%c0_1, %c0_2] : memref<1x128xf32, #tpu.memory_space<vmem>>, vector<1x128xf32>
    %3 = vector.broadcast %2 : vector<1x128xf32> to vector<64x128xf32>
    %4 = arith.mulf %1, %3 : vector<64x128xf32>
    %c0_3 = arith.constant 0 : index
    %c0_4 = arith.constant 0 : index
    %5 = vector.load %arg4[%c0_3, %c0_4] : memref<1x128xf32, #tpu.memory_space<vmem>>, vector<1x128xf32>
    %6 = vector.broadcast %5 : vector<1x128xf32> to vector<64x128xf32>
    %7 = arith.addf %4, %6 : vector<64x128xf32>
    %cst = arith.constant 0.000000e+00 : f32
    %8 = vector.broadcast %cst : f32 to vector<64x128xf32>
    %9 = arith.maximumf %7, %8 : vector<64x128xf32>
    %cst_5 = arith.constant 0.000000e+00 : bf16
    %10 = vector.broadcast %cst_5 : bf16 to vector<10x10x128xbf16>
    %c0_6 = arith.constant 0 : index
    %c0_7 = arith.constant 0 : index
    %c0_8 = arith.constant 0 : index
    %11 = vector.load %arg7[%c0_6, %c0_7, %c0_8] : memref<10x10x128xbf16, #tpu.memory_space<vmem>>, vector<10x10x128xbf16>
    tpu.vector_store %arg7[%c0_6, %c0_7, %c0_8], %10 {strides = array<i32>} : memref<10x10x128xbf16, #tpu.memory_space<vmem>>, vector<10x10x128xbf16>,
    %12 = arith.truncf %9 : vector<64x128xf32> to vector<64x128xbf16>
    %13 = vector.shape_cast %12 : vector<64x128xbf16> to vector<8x8x128xbf16>
    %c1 = arith.constant 1 : index
    %c1_9 = arith.constant 1 : index
    %c0_10 = arith.constant 0 : index
    %14 = vector.load %arg7[%c1, %c1_9, %c0_10] : memref<10x10x128xbf16, #tpu.memory_space<vmem>>, vector<8x8x128xbf16>
    tpu.vector_store %arg7[%c1, %c1_9, %c0_10], %13 {strides = array<i32>} : memref<10x10x128xbf16, #tpu.memory_space<vmem>>, vector<8x8x128xbf16>,
    %cst_11 = arith.constant 0.000000e+00 : f32
    %15 = vector.broadcast %cst_11 : f32 to vector<64x128xf32>
    %c0_12 = arith.constant 0 : index
    %c0_13 = arith.constant 0 : index
    %16 = vector.load %arg8[%c0_12, %c0_13] : memref<64x128xf32, #tpu.memory_space<vmem>>, vector<64x128xf32>
    tpu.vector_store %arg8[%c0_12, %c0_13], %15 {strides = array<i32>} : memref<64x128xf32, #tpu.memory_space<vmem>>, vector<64x128xf32>,
    %c0_14 = arith.constant 0 : index
    %c0_15 = arith.constant 0 : index
    %c0_16 = arith.constant 0 : index
    %17 = vector.load %arg7[%c0_14, %c0_15, %c0_16] : memref<10x10x128xbf16, #tpu.memory_space<vmem>>, vector<10x8x128xbf16>
    %18 = vector.extract_strided_slice %17 {offsets = [0, 0, 0], sizes = [8, 8, 128], strides = [1, 1, 1]} : vector<10x8x128xbf16> to vector<8x8x128xbf16>
    %19 = vector.shape_cast %18 : vector<8x8x128xbf16> to vector<64x128xbf16>
    %c0_17 = arith.constant 0 : index
    %c0_18 = arith.constant 0 : index
    %20 = vector.load %arg8[%c0_17, %c0_18] : memref<64x128xf32, #tpu.memory_space<vmem>>, vector<64x128xf32>
    %c0_19 = arith.constant 0 : index
    %c0_20 = arith.constant 0 : index
    %c0_21 = arith.constant 0 : index
    %c0_22 = arith.constant 0 : index
    %21 = vector.load %arg2[%c0_19, %c0_20, %c0_21, %c0_22] : memref<3x3x128x128xbf16, #tpu.memory_space<vmem>>, vector<1x1x128x128xbf16>
    %22 = vector.shape_cast %21 : vector<1x1x128x128xbf16> to vector<128x128xbf16>
    %cst_23 = arith.constant dense<0.000000e+00> : vector<64x128xf32>
    %23 = tpu.matmul %19, %22, %cst_23 {dimension_numbers = #tpu.dot_dimension_numbers<[1], [0], [0], [1], [0, 0, 1, 1], [], []>} : vector<64x128xbf16>, vector<128x128xbf16>, vector<64x128xf32> -> vector<64x128xf32>
    %24 = arith.addf %20, %23 : vector<64x128xf32>
    %c0_24 = arith.constant 0 : index
    %c0_25 = arith.constant 0 : index
    %25 = vector.load %arg8[%c0_24, %c0_25] : memref<64x128xf32, #tpu.memory_space<vmem>>, vector<64x128xf32>
    tpu.vector_store %arg8[%c0_24, %c0_25], %24 {strides = array<i32>} : memref<64x128xf32, #tpu.memory_space<vmem>>, vector<64x128xf32>,
    %26 = vector.extract_strided_slice %17 {offsets = [1, 0, 0], sizes = [8, 8, 128], strides = [1, 1, 1]} : vector<10x8x128xbf16> to vector<8x8x128xbf16>
    %27 = vector.shape_cast %26 : vector<8x8x128xbf16> to vector<64x128xbf16>
    %c0_26 = arith.constant 0 : index
    %c0_27 = arith.constant 0 : index
    %28 = vector.load %arg8[%c0_26, %c0_27] : memref<64x128xf32, #tpu.memory_space<vmem>>, vector<64x128xf32>
    %c1_28 = arith.constant 1 : index
    %c0_29 = arith.constant 0 : index
    %c0_30 = arith.constant 0 : index
    %c0_31 = arith.constant 0 : index
    %29 = vector.load %arg2[%c1_28, %c0_29, %c0_30, %c0_31] : memref<3x3x128x128xbf16, #tpu.memory_space<vmem>>, vector<1x1x128x128xbf16>
    %30 = vector.shape_cast %29 : vector<1x1x128x128xbf16> to vector<128x128xbf16>
    %cst_32 = arith.constant dense<0.000000e+00> : vector<64x128xf32>
    %31 = tpu.matmul %27, %30, %cst_32 {dimension_numbers = #tpu.dot_dimension_numbers<[1], [0], [0], [1], [0, 0, 1, 1], [], []>} : vector<64x128xbf16>, vector<128x128xbf16>, vector<64x128xf32> -> vector<64x128xf32>
    %32 = arith.addf %28, %31 : vector<64x128xf32>
    %c0_33 = arith.constant 0 : index
    %c0_34 = arith.constant 0 : index
    %33 = vector.load %arg8[%c0_33, %c0_34] : memref<64x128xf32, #tpu.memory_space<vmem>>, vector<64x128xf32>
    tpu.vector_store %arg8[%c0_33, %c0_34], %32 {strides = array<i32>} : memref<64x128xf32, #tpu.memory_space<vmem>>, vector<64x128xf32>,
    %34 = vector.extract_strided_slice %17 {offsets = [2, 0, 0], sizes = [8, 8, 128], strides = [1, 1, 1]} : vector<10x8x128xbf16> to vector<8x8x128xbf16>
    %35 = vector.shape_cast %34 : vector<8x8x128xbf16> to vector<64x128xbf16>
    %c0_35 = arith.constant 0 : index
    %c0_36 = arith.constant 0 : index
    %36 = vector.load %arg8[%c0_35, %c0_36] : memref<64x128xf32, #tpu.memory_space<vmem>>, vector<64x128xf32>
    %c2 = arith.constant 2 : index
    %c0_37 = arith.constant 0 : index
    %c0_38 = arith.constant 0 : index
    %c0_39 = arith.constant 0 : index
    %37 = vector.load %arg2[%c2, %c0_37, %c0_38, %c0_39] : memref<3x3x128x128xbf16, #tpu.memory_space<vmem>>, vector<1x1x128x128xbf16>
    %38 = vector.shape_cast %37 : vector<1x1x128x128xbf16> to vector<128x128xbf16>
    %cst_40 = arith.constant dense<0.000000e+00> : vector<64x128xf32>
    %39 = tpu.matmul %35, %38, %cst_40 {dimension_numbers = #tpu.dot_dimension_numbers<[1], [0], [0], [1], [0, 0, 1, 1], [], []>} : vector<64x128xbf16>, vector<128x128xbf16>, vector<64x128xf32> -> vector<64x128xf32>
    %40 = arith.addf %36, %39 : vector<64x128xf32>
    %c0_41 = arith.constant 0 : index
    %c0_42 = arith.constant 0 : index
    %41 = vector.load %arg8[%c0_41, %c0_42] : memref<64x128xf32, #tpu.memory_space<vmem>>, vector<64x128xf32>
    tpu.vector_store %arg8[%c0_41, %c0_42], %40 {strides = array<i32>} : memref<64x128xf32, #tpu.memory_space<vmem>>, vector<64x128xf32>,
    %c0_43 = arith.constant 0 : index
    %c1_44 = arith.constant 1 : index
    %c0_45 = arith.constant 0 : index
    %42 = vector.load %arg7[%c0_43, %c1_44, %c0_45] : memref<10x10x128xbf16, #tpu.memory_space<vmem>>, vector<10x8x128xbf16>
    %43 = vector.extract_strided_slice %42 {offsets = [0, 0, 0], sizes = [8, 8, 128], strides = [1, 1, 1]} : vector<10x8x128xbf16> to vector<8x8x128xbf16>
    %44 = vector.shape_cast %43 : vector<8x8x128xbf16> to vector<64x128xbf16>
    %c0_46 = arith.constant 0 : index
    %c0_47 = arith.constant 0 : index
    %45 = vector.load %arg8[%c0_46, %c0_47] : memref<64x128xf32, #tpu.memory_space<vmem>>, vector<64x128xf32>
    %c0_48 = arith.constant 0 : index
    %c1_49 = arith.constant 1 : index
    %c0_50 = arith.constant 0 : index
    %c0_51 = arith.constant 0 : index
    %46 = vector.load %arg2[%c0_48, %c1_49, %c0_50, %c0_51] : memref<3x3x128x128xbf16, #tpu.memory_space<vmem>>, vector<1x1x128x128xbf16>
    %47 = vector.shape_cast %46 : vector<1x1x128x128xbf16> to vector<128x128xbf16>
    %cst_52 = arith.constant dense<0.000000e+00> : vector<64x128xf32>
    %48 = tpu.matmul %44, %47, %cst_52 {dimension_numbers = #tpu.dot_dimension_numbers<[1], [0], [0], [1], [0, 0, 1, 1], [], []>} : vector<64x128xbf16>, vector<128x128xbf16>, vector<64x128xf32> -> vector<64x128xf32>
    %49 = arith.addf %45, %48 : vector<64x128xf32>
    %c0_53 = arith.constant 0 : index
    %c0_54 = arith.constant 0 : index
    %50 = vector.load %arg8[%c0_53, %c0_54] : memref<64x128xf32, #tpu.memory_space<vmem>>, vector<64x128xf32>
    tpu.vector_store %arg8[%c0_53, %c0_54], %49 {strides = array<i32>} : memref<64x128xf32, #tpu.memory_space<vmem>>, vector<64x128xf32>,
    %51 = vector.extract_strided_slice %42 {offsets = [1, 0, 0], sizes = [8, 8, 128], strides = [1, 1, 1]} : vector<10x8x128xbf16> to vector<8x8x128xbf16>
    %52 = vector.shape_cast %51 : vector<8x8x128xbf16> to vector<64x128xbf16>
    %c0_55 = arith.constant 0 : index
    %c0_56 = arith.constant 0 : index
    %53 = vector.load %arg8[%c0_55, %c0_56] : memref<64x128xf32, #tpu.memory_space<vmem>>, vector<64x128xf32>
    %c1_57 = arith.constant 1 : index
    %c1_58 = arith.constant 1 : index
    %c0_59 = arith.constant 0 : index
    %c0_60 = arith.constant 0 : index
    %54 = vector.load %arg2[%c1_57, %c1_58, %c0_59, %c0_60] : memref<3x3x128x128xbf16, #tpu.memory_space<vmem>>, vector<1x1x128x128xbf16>
    %55 = vector.shape_cast %54 : vector<1x1x128x128xbf16> to vector<128x128xbf16>
    %cst_61 = arith.constant dense<0.000000e+00> : vector<64x128xf32>
    %56 = tpu.matmul %52, %55, %cst_61 {dimension_numbers = #tpu.dot_dimension_numbers<[1], [0], [0], [1], [0, 0, 1, 1], [], []>} : vector<64x128xbf16>, vector<128x128xbf16>, vector<64x128xf32> -> vector<64x128xf32>
    %57 = arith.addf %53, %56 : vector<64x128xf32>
    %c0_62 = arith.constant 0 : index
    %c0_63 = arith.constant 0 : index
    %58 = vector.load %arg8[%c0_62, %c0_63] : memref<64x128xf32, #tpu.memory_space<vmem>>, vector<64x128xf32>
    tpu.vector_store %arg8[%c0_62, %c0_63], %57 {strides = array<i32>} : memref<64x128xf32, #tpu.memory_space<vmem>>, vector<64x128xf32>,
    %59 = vector.extract_strided_slice %42 {offsets = [2, 0, 0], sizes = [8, 8, 128], strides = [1, 1, 1]} : vector<10x8x128xbf16> to vector<8x8x128xbf16>
    %60 = vector.shape_cast %59 : vector<8x8x128xbf16> to vector<64x128xbf16>
    %c0_64 = arith.constant 0 : index
    %c0_65 = arith.constant 0 : index
    %61 = vector.load %arg8[%c0_64, %c0_65] : memref<64x128xf32, #tpu.memory_space<vmem>>, vector<64x128xf32>
    %c2_66 = arith.constant 2 : index
    %c1_67 = arith.constant 1 : index
    %c0_68 = arith.constant 0 : index
    %c0_69 = arith.constant 0 : index
    %62 = vector.load %arg2[%c2_66, %c1_67, %c0_68, %c0_69] : memref<3x3x128x128xbf16, #tpu.memory_space<vmem>>, vector<1x1x128x128xbf16>
    %63 = vector.shape_cast %62 : vector<1x1x128x128xbf16> to vector<128x128xbf16>
    %cst_70 = arith.constant dense<0.000000e+00> : vector<64x128xf32>
    %64 = tpu.matmul %60, %63, %cst_70 {dimension_numbers = #tpu.dot_dimension_numbers<[1], [0], [0], [1], [0, 0, 1, 1], [], []>} : vector<64x128xbf16>, vector<128x128xbf16>, vector<64x128xf32> -> vector<64x128xf32>
    %65 = arith.addf %61, %64 : vector<64x128xf32>
    %c0_71 = arith.constant 0 : index
    %c0_72 = arith.constant 0 : index
    %66 = vector.load %arg8[%c0_71, %c0_72] : memref<64x128xf32, #tpu.memory_space<vmem>>, vector<64x128xf32>
    tpu.vector_store %arg8[%c0_71, %c0_72], %65 {strides = array<i32>} : memref<64x128xf32, #tpu.memory_space<vmem>>, vector<64x128xf32>,
    %c0_73 = arith.constant 0 : index
    %c2_74 = arith.constant 2 : index
    %c0_75 = arith.constant 0 : index
    %67 = vector.load %arg7[%c0_73, %c2_74, %c0_75] : memref<10x10x128xbf16, #tpu.memory_space<vmem>>, vector<10x8x128xbf16>
    %68 = vector.extract_strided_slice %67 {offsets = [0, 0, 0], sizes = [8, 8, 128], strides = [1, 1, 1]} : vector<10x8x128xbf16> to vector<8x8x128xbf16>
    %69 = vector.shape_cast %68 : vector<8x8x128xbf16> to vector<64x128xbf16>
    %c0_76 = arith.constant 0 : index
    %c0_77 = arith.constant 0 : index
    %70 = vector.load %arg8[%c0_76, %c0_77] : memref<64x128xf32, #tpu.memory_space<vmem>>, vector<64x128xf32>
    %c0_78 = arith.constant 0 : index
    %c2_79 = arith.constant 2 : index
    %c0_80 = arith.constant 0 : index
    %c0_81 = arith.constant 0 : index
    %71 = vector.load %arg2[%c0_78, %c2_79, %c0_80, %c0_81] : memref<3x3x128x128xbf16, #tpu.memory_space<vmem>>, vector<1x1x128x128xbf16>
    %72 = vector.shape_cast %71 : vector<1x1x128x128xbf16> to vector<128x128xbf16>
    %cst_82 = arith.constant dense<0.000000e+00> : vector<64x128xf32>
    %73 = tpu.matmul %69, %72, %cst_82 {dimension_numbers = #tpu.dot_dimension_numbers<[1], [0], [0], [1], [0, 0, 1, 1], [], []>} : vector<64x128xbf16>, vector<128x128xbf16>, vector<64x128xf32> -> vector<64x128xf32>
    %74 = arith.addf %70, %73 : vector<64x128xf32>
    %c0_83 = arith.constant 0 : index
    %c0_84 = arith.constant 0 : index
    %75 = vector.load %arg8[%c0_83, %c0_84] : memref<64x128xf32, #tpu.memory_space<vmem>>, vector<64x128xf32>
    tpu.vector_store %arg8[%c0_83, %c0_84], %74 {strides = array<i32>} : memref<64x128xf32, #tpu.memory_space<vmem>>, vector<64x128xf32>,
    %76 = vector.extract_strided_slice %67 {offsets = [1, 0, 0], sizes = [8, 8, 128], strides = [1, 1, 1]} : vector<10x8x128xbf16> to vector<8x8x128xbf16>
    %77 = vector.shape_cast %76 : vector<8x8x128xbf16> to vector<64x128xbf16>
    %c0_85 = arith.constant 0 : index
    %c0_86 = arith.constant 0 : index
    %78 = vector.load %arg8[%c0_85, %c0_86] : memref<64x128xf32, #tpu.memory_space<vmem>>, vector<64x128xf32>
    %c1_87 = arith.constant 1 : index
    %c2_88 = arith.constant 2 : index
    %c0_89 = arith.constant 0 : index
    %c0_90 = arith.constant 0 : index
    %79 = vector.load %arg2[%c1_87, %c2_88, %c0_89, %c0_90] : memref<3x3x128x128xbf16, #tpu.memory_space<vmem>>, vector<1x1x128x128xbf16>
    %80 = vector.shape_cast %79 : vector<1x1x128x128xbf16> to vector<128x128xbf16>
    %cst_91 = arith.constant dense<0.000000e+00> : vector<64x128xf32>
    %81 = tpu.matmul %77, %80, %cst_91 {dimension_numbers = #tpu.dot_dimension_numbers<[1], [0], [0], [1], [0, 0, 1, 1], [], []>} : vector<64x128xbf16>, vector<128x128xbf16>, vector<64x128xf32> -> vector<64x128xf32>
    %82 = arith.addf %78, %81 : vector<64x128xf32>
    %c0_92 = arith.constant 0 : index
    %c0_93 = arith.constant 0 : index
    %83 = vector.load %arg8[%c0_92, %c0_93] : memref<64x128xf32, #tpu.memory_space<vmem>>, vector<64x128xf32>
    tpu.vector_store %arg8[%c0_92, %c0_93], %82 {strides = array<i32>} : memref<64x128xf32, #tpu.memory_space<vmem>>, vector<64x128xf32>,
    %84 = vector.extract_strided_slice %67 {offsets = [2, 0, 0], sizes = [8, 8, 128], strides = [1, 1, 1]} : vector<10x8x128xbf16> to vector<8x8x128xbf16>
    %85 = vector.shape_cast %84 : vector<8x8x128xbf16> to vector<64x128xbf16>
    %c0_94 = arith.constant 0 : index
    %c0_95 = arith.constant 0 : index
    %86 = vector.load %arg8[%c0_94, %c0_95] : memref<64x128xf32, #tpu.memory_space<vmem>>, vector<64x128xf32>
    %c2_96 = arith.constant 2 : index
    %c2_97 = arith.constant 2 : index
    %c0_98 = arith.constant 0 : index
    %c0_99 = arith.constant 0 : index
    %87 = vector.load %arg2[%c2_96, %c2_97, %c0_98, %c0_99] : memref<3x3x128x128xbf16, #tpu.memory_space<vmem>>, vector<1x1x128x128xbf16>
    %88 = vector.shape_cast %87 : vector<1x1x128x128xbf16> to vector<128x128xbf16>
    %cst_100 = arith.constant dense<0.000000e+00> : vector<64x128xf32>
    %89 = tpu.matmul %85, %88, %cst_100 {dimension_numbers = #tpu.dot_dimension_numbers<[1], [0], [0], [1], [0, 0, 1, 1], [], []>} : vector<64x128xbf16>, vector<128x128xbf16>, vector<64x128xf32> -> vector<64x128xf32>
    %90 = arith.addf %86, %89 : vector<64x128xf32>
    %c0_101 = arith.constant 0 : index
    %c0_102 = arith.constant 0 : index
    %91 = vector.load %arg8[%c0_101, %c0_102] : memref<64x128xf32, #tpu.memory_space<vmem>>, vector<64x128xf32>
    tpu.vector_store %arg8[%c0_101, %c0_102], %90 {strides = array<i32>} : memref<64x128xf32, #tpu.memory_space<vmem>>, vector<64x128xf32>,
    %c0_103 = arith.constant 0 : index
    %c0_104 = arith.constant 0 : index
    %92 = vector.load %arg8[%c0_103, %c0_104] : memref<64x128xf32, #tpu.memory_space<vmem>>, vector<64x128xf32>
    %93 = arith.truncf %92 : vector<64x128xf32> to vector<64x128xbf16>
    %c0_105 = arith.constant 0 : index
    %c0_106 = arith.constant 0 : index
    %94 = vector.load %arg5[%c0_105, %c0_106] : memref<64x128xbf16, #tpu.memory_space<vmem>>, vector<64x128xbf16>
    tpu.vector_store %arg5[%c0_105, %c0_106], %93 {strides = array<i32>} : memref<64x128xbf16, #tpu.memory_space<vmem>>, vector<64x128xbf16>,
    %cst_107 = arith.constant dense<0.000000e+00> : vector<128xf32>
    %95 = vector.multi_reduction <add>, %92, %cst_107 [0] : vector<64x128xf32> to vector<128xf32>
    %96 = vector.shape_cast %95 : vector<128xf32> to vector<1x128xf32>
    %c0_108 = arith.constant 0 : index
    %c0_109 = arith.constant 0 : index
    %c0_110 = arith.constant 0 : index
    %97 = vector.load %arg6[%c0_108, %c0_109, %c0_110] : memref<1x2x128xf32, #tpu.memory_space<vmem>>, vector<1x1x128xf32>
    %98 = vector.shape_cast %97 : vector<1x1x128xf32> to vector<1x128xf32>
    %99 = vector.shape_cast %96 : vector<1x128xf32> to vector<1x1x128xf32>
    tpu.vector_store %arg6[%c0_108, %c0_109, %c0_110], %99 {strides = array<i32>} : memref<1x2x128xf32, #tpu.memory_space<vmem>>, vector<1x1x128xf32>,
    %100 = arith.mulf %92, %92 : vector<64x128xf32>
    %cst_111 = arith.constant dense<0.000000e+00> : vector<128xf32>
    %101 = vector.multi_reduction <add>, %100, %cst_111 [0] : vector<64x128xf32> to vector<128xf32>
    %102 = vector.shape_cast %101 : vector<128xf32> to vector<1x128xf32>
    %c0_112 = arith.constant 0 : index
    %c1_113 = arith.constant 1 : index
    %c0_114 = arith.constant 0 : index
    %103 = vector.load %arg6[%c0_112, %c1_113, %c0_114] : memref<1x2x128xf32, #tpu.memory_space<vmem>>, vector<1x1x128xf32>
    %104 = vector.shape_cast %103 : vector<1x1x128xf32> to vector<1x128xf32>
    %105 = vector.shape_cast %102 : vector<1x128xf32> to vector<1x1x128xf32>
    tpu.vector_store %arg6[%c0_112, %c1_113, %c0_114], %105 {strides = array<i32>} : memref<1x2x128xf32, #tpu.memory_space<vmem>>, vector<1x1x128xf32>,
    return
  }
  func.func @transform_0(%arg0: i32) -> (i32, i32) {
    %c0_i32 = arith.constant 0 : i32
    %c0_i32_0 = arith.constant 0 : i32
    return %arg0, %c0_i32 : i32, i32
  }
  func.func @transform_1(%arg0: i32) -> (i32, i32, i32, i32) {
    %c0_i32 = arith.constant 0 : i32
    %c0_i32_0 = arith.constant 0 : i32
    %c0_i32_1 = arith.constant 0 : i32
    %c0_i32_2 = arith.constant 0 : i32
    %c0_i32_3 = arith.constant 0 : i32
    return %c0_i32, %c0_i32_0, %c0_i32_1, %c0_i32_2 : i32, i32, i32, i32
  }
  func.func @transform_2(%arg0: i32) -> (i32, i32) {
    %c0_i32 = arith.constant 0 : i32
    %c0_i32_0 = arith.constant 0 : i32
    %c0_i32_1 = arith.constant 0 : i32
    return %c0_i32, %c0_i32_0 : i32, i32
  }
  func.func @transform_3(%arg0: i32) -> (i32, i32) {
    %c0_i32 = arith.constant 0 : i32
    %c0_i32_0 = arith.constant 0 : i32
    %c0_i32_1 = arith.constant 0 : i32
    return %c0_i32, %c0_i32_0 : i32, i32
  }
  func.func @transform_4(%arg0: i32) -> (i32, i32) {
    %c0_i32 = arith.constant 0 : i32
    %c0_i32_0 = arith.constant 0 : i32
    return %arg0, %c0_i32 : i32, i32
  }
  func.func @transform_5(%arg0: i32) -> (i32, i32, i32) {
    %c0_i32 = arith.constant 0 : i32
    %c0_i32_0 = arith.constant 0 : i32
    %c0_i32_1 = arith.constant 0 : i32
    return %arg0, %c0_i32, %c0_i32_0 : i32, i32, i32
  }
}

module attributes {stable_mosaic.version = 11 : i64} {
  func.func @_stage3_kernel(%arg0: i32, %arg1: memref<128x128xbf16, #tpu.memory_space<vmem>>, %arg2: memref<128x128xbf16, #tpu.memory_space<vmem>>, %arg3: memref<128x128xbf16, #tpu.memory_space<vmem>>, %arg4: memref<1x128xf32, #tpu.memory_space<vmem>>, %arg5: memref<1x128xf32, #tpu.memory_space<vmem>>, %arg6: memref<1x128xf32, #tpu.memory_space<vmem>>, %arg7: memref<1x128xf32, #tpu.memory_space<vmem>>, %arg8: memref<128x128xf32, #tpu.memory_space<vmem>>) attributes {dimension_semantics = [#tpu.dimension_semantics<parallel>], iteration_bounds = array<i64: 1>, scalar_prefetch = 0 : i64, scratch_operands = 0 : i64, tpu.core_type = #tpu.core_type<tc>, window_params = [{transform_indices = @transform_0, window_bounds = array<i64: 128, 128>}, {transform_indices = @transform_1, window_bounds = array<i64: 128, 128>}, {pipeline_mode = #tpu.pipeline_mode<synchronous>, transform_indices = @transform_2, window_bounds = array<i64: 128, 128>}, {pipeline_mode = #tpu.pipeline_mode<synchronous>, transform_indices = @transform_3, window_bounds = array<i64: 1, 128>}, {pipeline_mode = #tpu.pipeline_mode<synchronous>, transform_indices = @transform_4, window_bounds = array<i64: 1, 128>}, {pipeline_mode = #tpu.pipeline_mode<synchronous>, transform_indices = @transform_5, window_bounds = array<i64: 1, 128>}, {pipeline_mode = #tpu.pipeline_mode<synchronous>, transform_indices = @transform_6, window_bounds = array<i64: 1, 128>}, {transform_indices = @transform_7, window_bounds = array<i64: 128, 128>}]} {
    %c0 = arith.constant 0 : index
    %c0_0 = arith.constant 0 : index
    %0 = vector.load %arg2[%c0, %c0_0] : memref<128x128xbf16, #tpu.memory_space<vmem>>, vector<128x128xbf16>
    %1 = arith.extf %0 : vector<128x128xbf16> to vector<128x128xf32>
    %c0_1 = arith.constant 0 : index
    %c0_2 = arith.constant 0 : index
    %2 = vector.load %arg6[%c0_1, %c0_2] : memref<1x128xf32, #tpu.memory_space<vmem>>, vector<1x128xf32>
    %3 = vector.broadcast %2 : vector<1x128xf32> to vector<128x128xf32>
    %4 = arith.mulf %1, %3 : vector<128x128xf32>
    %c0_3 = arith.constant 0 : index
    %c0_4 = arith.constant 0 : index
    %5 = vector.load %arg7[%c0_3, %c0_4] : memref<1x128xf32, #tpu.memory_space<vmem>>, vector<1x128xf32>
    %6 = vector.broadcast %5 : vector<1x128xf32> to vector<128x128xf32>
    %7 = arith.addf %4, %6 : vector<128x128xf32>
    %cst = arith.constant 0.000000e+00 : f32
    %8 = vector.broadcast %cst : f32 to vector<128x128xf32>
    %9 = arith.maximumf %7, %8 : vector<128x128xf32>
    %10 = arith.truncf %9 : vector<128x128xf32> to vector<128x128xbf16>
    %c0_5 = arith.constant 0 : index
    %c0_6 = arith.constant 0 : index
    %11 = vector.load %arg3[%c0_5, %c0_6] : memref<128x128xbf16, #tpu.memory_space<vmem>>, vector<128x128xbf16>
    %cst_7 = arith.constant dense<0.000000e+00> : vector<128x128xf32>
    %12 = tpu.matmul %10, %11, %cst_7 {dimension_numbers = #tpu.dot_dimension_numbers<[1], [0], [0], [1], [0, 0, 1, 1], [], []>} : vector<128x128xbf16>, vector<128x128xbf16>, vector<128x128xf32> -> vector<128x128xf32>
    %c0_8 = arith.constant 0 : index
    %c0_9 = arith.constant 0 : index
    %13 = vector.load %arg1[%c0_8, %c0_9] : memref<128x128xbf16, #tpu.memory_space<vmem>>, vector<128x128xbf16>
    %14 = arith.extf %13 : vector<128x128xbf16> to vector<128x128xf32>
    %c0_10 = arith.constant 0 : index
    %c0_11 = arith.constant 0 : index
    %15 = vector.load %arg4[%c0_10, %c0_11] : memref<1x128xf32, #tpu.memory_space<vmem>>, vector<1x128xf32>
    %16 = vector.broadcast %15 : vector<1x128xf32> to vector<128x128xf32>
    %17 = arith.mulf %14, %16 : vector<128x128xf32>
    %c0_12 = arith.constant 0 : index
    %c0_13 = arith.constant 0 : index
    %18 = vector.load %arg5[%c0_12, %c0_13] : memref<1x128xf32, #tpu.memory_space<vmem>>, vector<1x128xf32>
    %19 = vector.broadcast %18 : vector<1x128xf32> to vector<128x128xf32>
    %20 = arith.addf %17, %19 : vector<128x128xf32>
    %21 = arith.addf %20, %12 : vector<128x128xf32>
    %cst_14 = arith.constant 0.000000e+00 : f32
    %22 = vector.broadcast %cst_14 : f32 to vector<128x128xf32>
    %23 = arith.maximumf %21, %22 : vector<128x128xf32>
    %c0_15 = arith.constant 0 : index
    %c0_16 = arith.constant 0 : index
    %24 = vector.load %arg8[%c0_15, %c0_16] : memref<128x128xf32, #tpu.memory_space<vmem>>, vector<128x128xf32>
    tpu.vector_store %arg8[%c0_15, %c0_16], %23 {strides = array<i32>} : memref<128x128xf32, #tpu.memory_space<vmem>>, vector<128x128xf32>,
    return
  }
  func.func @transform_0(%arg0: i32) -> (i32, i32) {
    %c0_i32 = arith.constant 0 : i32
    %c0_i32_0 = arith.constant 0 : i32
    return %arg0, %c0_i32 : i32, i32
  }
  func.func @transform_1(%arg0: i32) -> (i32, i32) {
    %c0_i32 = arith.constant 0 : i32
    %c0_i32_0 = arith.constant 0 : i32
    return %arg0, %c0_i32 : i32, i32
  }
  func.func @transform_2(%arg0: i32) -> (i32, i32) {
    %c0_i32 = arith.constant 0 : i32
    %c0_i32_0 = arith.constant 0 : i32
    %c0_i32_1 = arith.constant 0 : i32
    return %c0_i32, %c0_i32_0 : i32, i32
  }
  func.func @transform_3(%arg0: i32) -> (i32, i32) {
    %c0_i32 = arith.constant 0 : i32
    %c0_i32_0 = arith.constant 0 : i32
    %c0_i32_1 = arith.constant 0 : i32
    return %c0_i32, %c0_i32_0 : i32, i32
  }
  func.func @transform_4(%arg0: i32) -> (i32, i32) {
    %c0_i32 = arith.constant 0 : i32
    %c0_i32_0 = arith.constant 0 : i32
    %c0_i32_1 = arith.constant 0 : i32
    return %c0_i32, %c0_i32_0 : i32, i32
  }
  func.func @transform_5(%arg0: i32) -> (i32, i32) {
    %c0_i32 = arith.constant 0 : i32
    %c0_i32_0 = arith.constant 0 : i32
    %c0_i32_1 = arith.constant 0 : i32
    return %c0_i32, %c0_i32_0 : i32, i32
  }
  func.func @transform_6(%arg0: i32) -> (i32, i32) {
    %c0_i32 = arith.constant 0 : i32
    %c0_i32_0 = arith.constant 0 : i32
    %c0_i32_1 = arith.constant 0 : i32
    return %c0_i32, %c0_i32_0 : i32, i32
  }
  func.func @transform_7(%arg0: i32) -> (i32, i32) {
    %c0_i32 = arith.constant 0 : i32
    %c0_i32_0 = arith.constant 0 : i32
    return %arg0, %c0_i32 : i32, i32
  }
}

</mosaic_0001>

<bundles_post_ra>
// kernel: conv_block_forward.5
= control target key start
LH: loop header
LB: loop body
LE: loop exit
PB: predicated region body
PF: predicated region fallthrough
CT: control target
= control target key end

     0   :  { %s808_s2 = inlined_call_operand.vmem [shape: bf16[128,128], index: 2, kind: input, shape index: {}]   ;;  %s809_s1 = inlined_call_operand.vmem [shape: bf16[128,128], index: 1, kind: input, shape index: {}]   ;;  %s810_s5 = inlined_call_operand.vmem [shape: f32[1,128], index: 5, kind: input, shape index: {}]   ;;  %s811_s6 = inlined_call_operand.vmem [shape: f32[1,128], index: 6, kind: input, shape index: {}]   ;;  %s812_s0 = inlined_call_operand.vmem [shape: bf16[128,128], index: 0, kind: input, shape index: {}]   ;;  %s813_s3 = inlined_call_operand.vmem [shape: f32[1,128], index: 3, kind: input, shape index: {}]   ;;  %s814_s4 = inlined_call_operand.vmem [shape: f32[1,128], index: 4, kind: input, shape index: {}]   ;;  %s815_s7 = inlined_call_operand.vmem [shape: f32[128,128], index: 7, kind: output, shape index: {}]  }
   0x1   :  { %v574_v0 = vld [vmem:[%s808_s2] sm:$0xff]   ;;  %v575_v1 = vld [vmem:[%s808_s2 + $0x8] sm:$0xff]   ;;  %v576_v2 = vld [vmem:[%s808_s2 + $0x10] sm:$0xff]  }
   0x2   :  { %526 = vmatprep.subr.bf16.mxu0 %v574_v0  ;;  %558 = vmatprep.subr.bf16.mxu1 %v574_v0  ;;  %v577_v3 = vld [vmem:[%s808_s2 + $0x18] sm:$0xff]   ;;  %v433_v4 = vld [vmem:[%s809_s1] sm:$0xff]   ;;  %v496_v9 = vld [vmem:[%s809_s1 + $0x8] sm:$0xff]  }
   0x3   :  { %527 = vmatpush3.bf16.msra.mxu0 %v574_v0  ;;  %566 = vmatpush3.bf16.msra.mxu1 %v574_v0  ;;  %v640_v5 = vld [vmem:[%s810_s5] ss:$0 sm:$0xff]  ;;  %v434_v6 = vunpack.c.l.bf16 %v433_v4  ;;  %v435_v7 = vunpack.c.h.bf16 %v433_v4  ;;  %v500_v13 = vld [vmem:[%s809_s1 + $0x28] sm:$0xff]   ;;  %v497_v16 = vld [vmem:[%s809_s1 + $0x10] sm:$0xff]   ;;  %v438_v20 = vunpack.c.l.bf16 %v496_v9  ;;  %v439_v21 = vunpack.c.h.bf16 %v496_v9 }
   0x4   :  { %528 = vmatprep.subr.bf16.mxu0 %v575_v1  ;;  %559 = vmatprep.subr.bf16.mxu1 %v575_v1  ;;  %v499_v8 = vld [vmem:[%s809_s1 + $0x20] sm:$0xff]   ;;  %v454_v24 = vunpack.c.l.bf16 %v500_v13  ;;  %v455_v25 = vunpack.c.h.bf16 %v500_v13  ;;  %v442_v28 = vunpack.c.l.bf16 %v497_v16  ;;  %v501_v31 = vld [vmem:[%s809_s1 + $0x30] sm:$0xff]   ;;  %v579_v32 = vld [vmem:[%s808_s2 + $0x28] sm:$0xff]   ;;  %v443_v40 = vunpack.c.h.bf16 %v497_v16 }
   0x5   :  { %v651_v10 = vld [vmem:[%s811_s6] ss:$0 sm:$0xff]  ;;  %v450_v11 = vunpack.c.l.bf16 %v499_v8  ;;  %v451_v12 = vunpack.c.h.bf16 %v499_v8  ;;  %v66_v14 = vmul.f32 %v434_v6, %v640_v5  ;;  %v67_v15 = vmul.f32 %v435_v7, %v640_v5  ;;  %v498_v44 = vld [vmem:[%s809_s1 + $0x18] sm:$0xff]   ;;  %v580_v48 = vld [vmem:[%s808_s2 + $0x30] sm:$0xff]  }
   0x6   :  { %v578_v17 = vld [vmem:[%s808_s2 + $0x20] sm:$0xff]   ;;  %v68_v35 = vmul.f32 %v438_v20, %v640_v5  ;;  %v69_v36 = vmul.f32 %v439_v21, %v640_v5  ;;  %v76_v38 = vmul.f32 %v454_v24, %v640_v5  ;;  %v77_v39 = vmul.f32 %v455_v25, %v640_v5  ;;  %v502_v47 = vld [vmem:[%s809_s1 + $0x38] sm:$0xff]  }
   0x7   :  { %529 = vmatpush3.bf16.msra.mxu0 %v575_v1  ;;  %567 = vmatpush3.bf16.msra.mxu1 %v575_v1  ;;  %v74_v18 = vmul.f32 %v450_v11, %v640_v5  ;;  %v75_v19 = vmul.f32 %v451_v12, %v640_v5  ;;  %v89_v22 = vadd.f32 %v651_v10, %v66_v14  ;;  %v458_v43 = vunpack.c.l.bf16 %v501_v31  ;;  %v581_v63 = vld [vmem:[%s808_s2 + $0x38] sm:$0xff]  }
   0x8   :  { %530 = vmatprep.subr.bf16.mxu0 %v576_v2  ;;  %560 = vmatprep.subr.bf16.mxu1 %v576_v2  ;;  %v90_v23 = vadd.f32 %v651_v10, %v67_v15  ;;  %v70_v42 = vmul.f32 %v442_v28, %v640_v5  ;;  %v71_v45 = vmul.f32 %v443_v40, %v640_v5  ;;  %v459_v46 = vunpack.c.h.bf16 %v501_v31  ;;  %v465_v28 = vld [vmem:[%s812_s0] sm:$0xff]  }
   0x9   :  { %v97_v26 = vadd.f32 %v651_v10, %v74_v18  ;;  %v98_v27 = vadd.f32 %v651_v10, %v75_v19  ;;  %v105_v29 = vmax.f32 %v89_v22, 0.0  ;;  %v91_v49 = vadd.f32 %v651_v10, %v68_v35 }
   0xa   :  { %v106_v30 = vmax.f32 %v90_v23, 0.0  ;;  %v92_v50 = vadd.f32 %v651_v10, %v69_v36  ;;  %v78_v51 = vmul.f32 %v458_v43, %v640_v5  ;;  %v99_v52 = vadd.f32 %v651_v10, %v76_v38  ;;  %v504_v43 = vld [vmem:[%s812_s0 + $0x10] sm:$0xff]  }
   0xb   :  { %531 = vmatpush3.bf16.msra.mxu0 %v576_v2  ;;  %568 = vmatpush3.bf16.msra.mxu1 %v576_v2  ;;  %v113_v33 = vmax.f32 %v97_v26, 0.0  ;;  %v114_v34 = vmax.f32 %v98_v27, 0.0  ;;  %v100_v53 = vadd.f32 %v651_v10, %v77_v39  ;;  %v79_v54 = vmul.f32 %v459_v46, %v640_v5  ;;  %v507_v27 = vld [vmem:[%s812_s0 + $0x28] sm:$0xff]   ;;  %v505_v39 = vld [vmem:[%s812_s0 + $0x18] sm:$0xff]  }
   0xc   :  { %532 = vmatprep.subr.bf16.mxu0 %v577_v3  ;;  %561 = vmatprep.subr.bf16.mxu1 %v577_v3  ;;  %v121_v37 = vpack.c.bf16 %v106_v30, %v105_v29  ;;  %v446_v55 = vunpack.c.l.bf16 %v498_v44  ;;  %v93_v56 = vadd.f32 %v651_v10, %v70_v42  ;;  %v447_v57 = vunpack.c.h.bf16 %v498_v44  ;;  %v506_v29 = vld [vmem:[%s812_s0 + $0x20] sm:$0xff]   ;;  %v509_v42 = vld [vmem:[%s812_s0 + $0x38] sm:$0xff]   ;;  %v508_v44 = vld [vmem:[%s812_s0 + $0x30] sm:$0xff]  }
   0xd   :  { %v125_v41 = vpack.c.bf16 %v114_v34, %v113_v33  ;;  %v462_v58 = vunpack.c.l.bf16 %v502_v47  ;;  %v463_v59 = vunpack.c.h.bf16 %v502_v47  ;;  %v94_v60 = vadd.f32 %v651_v10, %v71_v45  ;;  %v742_v45 = vld [vmem:[%s814_s4] ss:$0 sm:$0xff] }
   0xe   :  { %542 = vmatprep.mubr.bf16.mxu0 %v121_v37  ;;  %v101_v61 = vadd.f32 %v651_v10, %v78_v51  ;;  %v102_v62 = vadd.f32 %v651_v10, %v79_v54  ;;  %v107_v0 = vmax.f32 %v91_v49, 0.0  ;;  %v108_v1 = vmax.f32 %v92_v50, 0.0 }
   0xf   :  { %533 = vmatpush3.bf16.msra.mxu0 %v577_v3  ;;  %569 = vmatpush3.bf16.msra.mxu1 %v577_v3  ;;  %v115_v2 = vmax.f32 %v99_v52, 0.0  ;;  %v116_v3 = vmax.f32 %v100_v53, 0.0  ;;  %v72_v4 = vmul.f32 %v446_v55, %v640_v5  ;;  %v73_v6 = vmul.f32 %v447_v57, %v640_v5 }
  0x10   :  { %534 = vmatprep.subr.bf16.mxu0 %v578_v17  ;;  %562 = vmatprep.subr.bf16.mxu1 %v578_v17  ;;  %v80_v7 = vmul.f32 %v462_v58, %v640_v5  ;;  %v81_v8 = vmul.f32 %v463_v59, %v640_v5  ;;  %v109_v9 = vmax.f32 %v93_v56, 0.0  ;;  %v110_v11 = vmax.f32 %v94_v60, 0.0 }
  0x11   :  { %550 = vmatprep.mubr.bf16.mxu1 %v125_v41  ;;  %v117_v12 = vmax.f32 %v101_v61, 0.0  ;;  %v118_v13 = vmax.f32 %v102_v62, 0.0  ;;  %v122_v14 = vpack.c.bf16 %v108_v1, %v107_v0  ;;  %v126_v15 = vpack.c.bf16 %v116_v3, %v115_v2 }
  0x12   :  { %v95_v16 = vadd.f32 %v651_v10, %v72_v4  ;;  %v103_v18 = vadd.f32 %v651_v10, %v80_v7  ;;  %v104_v19 = vadd.f32 %v651_v10, %v81_v8  ;;  %v123_v5 = vpack.c.bf16 %v110_v11, %v109_v9 }
  0x13   :  { %535 = vmatpush3.bf16.msra.mxu0 %v578_v17  ;;  %570 = vmatpush3.bf16.msra.mxu1 %v578_v17  ;;  %v96_v17 = vadd.f32 %v651_v10, %v73_v6  ;;  %v127_v20 = vpack.c.bf16 %v118_v13, %v117_v12  ;;  %v503_v10 = vld [vmem:[%s812_s0 + $0x8] sm:$0xff]   ;;  %v486_v31 = vunpack.c.l.bf16 %v507_v27  ;;  %v466_v33 = vunpack.c.l.bf16 %v465_v28 }
  0x14   :  { %536 = vmatprep.subr.bf16.mxu0 %v579_v32  ;;  %563 = vmatprep.subr.bf16.mxu1 %v579_v32  ;;  %v111_v21 = vmax.f32 %v95_v16, 0.0  ;;  %v119_v23 = vmax.f32 %v103_v18, 0.0  ;;  %v120_v24 = vmax.f32 %v104_v19, 0.0  ;;  %v470_v30 = vunpack.c.l.bf16 %v503_v10 }
  0x15   :  { %v112_v22 = vmax.f32 %v96_v17, 0.0  ;;  %v482_v34 = vunpack.c.l.bf16 %v506_v29  ;;  %v471_v35 = vunpack.c.h.bf16 %v503_v10  ;;  %v487_v36 = vunpack.c.h.bf16 %v507_v27 }
  0x16   :  { %v128_v26 = vpack.c.bf16 %v120_v24, %v119_v23  ;;  %v467_v37 = vunpack.c.h.bf16 %v465_v28  ;;  %v483_v38 = vunpack.c.h.bf16 %v506_v29  ;;  %v478_v52 = vunpack.c.l.bf16 %v505_v39 }
  0x17   :  { %537 = vmatpush3.bf16.msra.mxu0 %v579_v32  ;;  %571 = vmatpush3.bf16.msra.mxu1 %v579_v32  ;;  %v124_v25 = vpack.c.bf16 %v112_v22, %v111_v21  ;;  %v430_v32 = vld [vmem:[%s813_s3] ss:$0 sm:$0xff]  ;;  %v494_v53 = vunpack.c.l.bf16 %v509_v42  ;;  %v474_v54 = vunpack.c.l.bf16 %v504_v43  ;;  %v490_v55 = vunpack.c.l.bf16 %v508_v44 }
  0x18   :  { %538 = vmatprep.subr.bf16.mxu0 %v580_v48  ;;  %564 = vmatprep.subr.bf16.mxu1 %v580_v48  ;;  %v331_v40 = vmul.f32 %v470_v30, %v430_v32  ;;  %v339_v41 = vmul.f32 %v486_v31, %v430_v32  ;;  %v329_v46 = vmul.f32 %v466_v33, %v430_v32  ;;  %v479_v58 = vunpack.c.h.bf16 %v505_v39 }
  0x19   :  { %v337_v47 = vmul.f32 %v482_v34, %v430_v32  ;;  %v340_v49 = vmul.f32 %v487_v36, %v430_v32  ;;  %v330_v50 = vmul.f32 %v467_v37, %v430_v32  ;;  %v338_v51 = vmul.f32 %v483_v38, %v430_v32 }
  0x1a   :  { %v354_v56 = vadd.f32 %v742_v45, %v331_v40  ;;  %v362_v57 = vadd.f32 %v742_v45, %v339_v41  ;;  %v495_v59 = vunpack.c.h.bf16 %v509_v42  ;;  %v352_v60 = vadd.f32 %v742_v45, %v329_v46 }
  0x1b   :  { %539 = vmatpush3.bf16.msra.mxu0 %v580_v48  ;;  %572 = vmatpush3.bf16.msra.mxu1 %v580_v48  ;;  %v332_v48 = vmul.f32 %v471_v35, %v430_v32  ;;  %v360_v61 = vadd.f32 %v742_v45, %v337_v47  ;;  %v475_v62 = vunpack.c.h.bf16 %v504_v43  ;;  %v363_v1 = vadd.f32 %v742_v45, %v340_v49 }
  0x1c   :  { %540 = vmatprep.subr.bf16.mxu0 %v581_v63  ;;  %565 = vmatprep.subr.bf16.mxu1 %v581_v63  ;;  %v353_v2 = vadd.f32 %v742_v45, %v330_v50  ;;  %v361_v3 = vadd.f32 %v742_v45, %v338_v51  ;;  %v335_v7 = vmul.f32 %v478_v52, %v430_v32 }
  0x1d   :  { %v355_v0 = vadd.f32 %v742_v45, %v332_v48  ;;  %v343_v8 = vmul.f32 %v494_v53, %v430_v32  ;;  %v333_v9 = vmul.f32 %v474_v54, %v430_v32  ;;  %v341_v11 = vmul.f32 %v490_v55, %v430_v32 }
  0x1e   :  { %v336_v16 = vmul.f32 %v479_v58, %v430_v32  ;;  %v344_v17 = vmul.f32 %v495_v59, %v430_v32  ;;  %v334_v21 = vmul.f32 %v475_v62, %v430_v32  ;;  %v358_v34 = vadd.f32 %v742_v45, %v335_v7 }
  0x1f   :  { %541 = vmatpush3.bf16.msra.mxu0 %v581_v63  ;;  %573 = vmatpush3.bf16.msra.mxu1 %v581_v63  ;;  %v491_v63 = vunpack.c.h.bf16 %v508_v44  ;;  %v366_v35 = vadd.f32 %v742_v45, %v343_v8  ;;  %v356_v38 = vadd.f32 %v742_v45, %v333_v9  ;;  %v364_v39 = vadd.f32 %v742_v45, %v341_v11 }
  0x20   :  { %v359_v40 = vadd.f32 %v742_v45, %v336_v16  ;;  %v367_v41 = vadd.f32 %v742_v45, %v344_v17  ;;  %v357_v44 = vadd.f32 %v742_v45, %v334_v21 }
  0x21   :  { %v342_v22 = vmul.f32 %v491_v63, %v430_v32 }
  0x22   :  { %543 = vmatmul.mubr.bf16.vlgmr.msra.gmra.mrb[0].mxu0 %v122_v14  ;;  %551 = vmatmul.mubr.bf16.vlgmr.msra.gmra.mrb[0].mxu1 %v126_v15 }
  0x23   :  { %546 = vmatprep.mubr.bf16.mxu0 %v123_v5  ;;  %554 = vmatprep.mubr.bf16.mxu1 %v127_v20  ;;  %v365_v46 = vadd.f32 %v742_v45, %v342_v22 }
  0x2a   :  { %547 = vmatmul.mubr.bf16.gmra.mrb[4].mxu0 %v124_v25  ;;  %555 = vmatmul.mubr.bf16.gmra.mrb[4].mxu1 %v128_v26 }
  0xf5   :  { %v544_v4 = vpop.f32.mrb[0].mxu0  ;;  %v552_v6 = vpop.f32.mrb[0].mxu1 }
  0xf6   :  { %v370_v12 = vadd.f32 %v544_v4, %v354_v56  ;;  %v378_v13 = vadd.f32 %v552_v6, %v362_v57  ;;  %v227_v14 = vpop.f32.mrb[1].mxu0  ;;  %v259_v15 = vpop.f32.mrb[1].mxu1 }
  0xf7   :  { %v368_v18 = vadd.f32 %v352_v60, %v227_v14  ;;  %v376_v19 = vadd.f32 %v360_v61, %v259_v15  ;;  %v545_v5 = vpop.f32.mrb[2].mxu0  ;;  %v553_v20 = vpop.f32.mrb[2].mxu1 }
  0xf8   :  { %v386_v23 = vmax.f32 %v370_v12, 0.0  ;;  %v394_v24 = vmax.f32 %v378_v13, 0.0  ;;  %v371_v25 = vadd.f32 %v545_v5, %v355_v0  ;;  %v379_v26 = vadd.f32 %v553_v20, %v363_v1  ;;  %v230_v10 = vpop.f32.mrb[3].mxu0  ;;  %v262_v27 = vpop.f32.mrb[3].mxu1 }
  0xf9   :  { %v384_v28 = vmax.f32 %v368_v18, 0.0  ;;  %v392_v29 = vmax.f32 %v376_v19, 0.0  ;;  %v369_v30 = vadd.f32 %v353_v2, %v230_v10  ;;  %v377_v31 = vadd.f32 %v361_v3, %v262_v27 }
  0xfa   :  { %402 = vst [vmem:[%s815_s7 + $0x10] sm:$0xff] %v386_v23  ;;  %410 = vst [vmem:[%s815_s7 + $0x50] sm:$0xff] %v394_v24  ;;  %v387_v33 = vmax.f32 %v371_v25, 0.0  ;;  %v395_v32 = vmax.f32 %v379_v26, 0.0 }
  0xfb   :  { %400 = vst [vmem:[%s815_s7] sm:$0xff] %v384_v28  ;;  %408 = vst [vmem:[%s815_s7 + $0x40] sm:$0xff] %v392_v29  ;;  %v385_v36 = vmax.f32 %v369_v30, 0.0  ;;  %v393_v37 = vmax.f32 %v377_v31, 0.0 }
  0xfc   :  { %403 = vst [vmem:[%s815_s7 + $0x18] sm:$0xff] %v387_v33  ;;  %411 = vst [vmem:[%s815_s7 + $0x58] sm:$0xff] %v395_v32 }
  0xfd   :  { %401 = vst [vmem:[%s815_s7 + $0x8] sm:$0xff] %v385_v36  ;;  %409 = vst [vmem:[%s815_s7 + $0x48] sm:$0xff] %v393_v37  ;;  %v548_v42 = vpop.f32.mrb[4].mxu0  ;;  %v556_v43 = vpop.f32.mrb[4].mxu1 }
  0xfe   :  { %v374_v47 = vadd.f32 %v548_v42, %v358_v34  ;;  %v382_v48 = vadd.f32 %v556_v43, %v366_v35  ;;  %v243_v49 = vpop.f32.mrb[5].mxu0  ;;  %v275_v50 = vpop.f32.mrb[5].mxu1 }
  0xff   :  { %v372_v51 = vadd.f32 %v356_v38, %v243_v49  ;;  %v380_v52 = vadd.f32 %v364_v39, %v275_v50  ;;  %v549_v53 = vpop.f32.mrb[6].mxu0  ;;  %v557_v54 = vpop.f32.mrb[6].mxu1 }
 0x100   :  { %v390_v55 = vmax.f32 %v374_v47, 0.0  ;;  %v398_v56 = vmax.f32 %v382_v48, 0.0  ;;  %v375_v57 = vadd.f32 %v549_v53, %v359_v40  ;;  %v383_v58 = vadd.f32 %v557_v54, %v367_v41  ;;  %v246_v59 = vpop.f32.mrb[7].mxu0  ;;  %v278_v60 = vpop.f32.mrb[7].mxu1 }
 0x101   :  { %v388_v61 = vmax.f32 %v372_v51, 0.0  ;;  %v396_v62 = vmax.f32 %v380_v52, 0.0  ;;  %v373_v63 = vadd.f32 %v357_v44, %v246_v59  ;;  %v381_v0 = vadd.f32 %v365_v46, %v278_v60 }
 0x102   :  { %406 = vst [vmem:[%s815_s7 + $0x30] sm:$0xff] %v390_v55  ;;  %414 = vst [vmem:[%s815_s7 + $0x70] sm:$0xff] %v398_v56  ;;  %v391_v45 = vmax.f32 %v375_v57, 0.0  ;;  %v399_v1 = vmax.f32 %v383_v58, 0.0 }
 0x103   :  { %404 = vst [vmem:[%s815_s7 + $0x20] sm:$0xff] %v388_v61  ;;  %412 = vst [vmem:[%s815_s7 + $0x60] sm:$0xff] %v396_v62  ;;  %v389_v2 = vmax.f32 %v373_v63, 0.0  ;;  %v397_v3 = vmax.f32 %v381_v0, 0.0 }
 0x104   :  { %407 = vst [vmem:[%s815_s7 + $0x38] sm:$0xff] %v391_v45  ;;  %415 = vst [vmem:[%s815_s7 + $0x78] sm:$0xff] %v399_v1 }
 0x105   :  { %405 = vst [vmem:[%s815_s7 + $0x28] sm:$0xff] %v389_v2  ;;  %413 = vst [vmem:[%s815_s7 + $0x68] sm:$0xff] %v397_v3 }

// kernel: conv_block_forward.3
= control target key start
LH: loop header
LB: loop body
LE: loop exit
PB: predicated region body
PF: predicated region fallthrough
CT: control target
= control target key end

     0   :  { %v852_v1 = vmov 0   ;;  %s1091_s1 = inlined_call_operand.vmem [shape: bf16[128,256], index: 1, kind: input, shape index: {}]   ;;  %s1092_s0 = inlined_call_operand.vmem [shape: bf16[128,128], index: 0, kind: input, shape index: {}]   ;;  %s1093_s2 = inlined_call_operand.vmem [shape: bf16[128,128], index: 2, kind: output, shape index: {0}]   ;;  %s1094_s3 = inlined_call_operand.vmem [shape: bf16[128,128], index: 3, kind: output, shape index: {1}]   ;;  %s1095_s4 = inlined_call_operand.vmem [shape: f32[1,2,256], index: 4, kind: output, shape index: {2}]  }
   0x1   :  { %v820_v0 = vld [vmem:[%s1091_s1 + $0x4] ss:$8 sps:$4 sm:$0xff]   ;;  %207 = vmatprep.mubr.bf16.mxu0 %v852_v1  ;;  %247 = vmatprep.mubr.bf16.mxu1 %v852_v1  ;;  %v822_v2 = vld [vmem:[%s1091_s1] ss:$8 sps:$4 sm:$0xff]   ;;  %v823_v3 = vld [vmem:[%s1091_s1 + $0x14] ss:$8 sps:$4 sm:$0xff]  }
   0x2   :  { %175 = vmatprep.subr.bf16.mxu0 %v820_v0  ;;  %802 = vmatprep.subr.bf16.mxu1 %v820_v0  ;;  %v825_v4 = vld [vmem:[%s1091_s1 + $0x10] ss:$8 sps:$4 sm:$0xff]   ;;  %v826_v5 = vld [vmem:[%s1091_s1 + $0x24] ss:$8 sps:$4 sm:$0xff]   ;;  %v828_v6 = vld [vmem:[%s1091_s1 + $0x20] ss:$8 sps:$4 sm:$0xff]  }
   0x3   :  { %176 = vmatpush1.bf16.msra.mxu0 %v822_v2  ;;  %810 = vmatpush1.bf16.msra.mxu1 %v822_v2  ;;  %v829_v7 = vld [vmem:[%s1091_s1 + $0x34] ss:$8 sps:$4 sm:$0xff]   ;;  %v831_v8 = vld [vmem:[%s1091_s1 + $0x30] ss:$8 sps:$4 sm:$0xff]   ;;  %v832_v9 = vld [vmem:[%s1091_s1 + $0x44] ss:$8 sps:$4 sm:$0xff]  }
   0x4   :  { %177 = vmatprep.subr.bf16.mxu0 %v823_v3  ;;  %803 = vmatprep.subr.bf16.mxu1 %v823_v3  ;;  %v834_v10 = vld [vmem:[%s1091_s1 + $0x40] ss:$8 sps:$4 sm:$0xff]   ;;  %v835_v11 = vld [vmem:[%s1091_s1 + $0x54] ss:$8 sps:$4 sm:$0xff]   ;;  %v837_v12 = vld [vmem:[%s1091_s1 + $0x50] ss:$8 sps:$4 sm:$0xff]  }
   0x5   :  { %v838_v13 = vld [vmem:[%s1091_s1 + $0x64] ss:$8 sps:$4 sm:$0xff]   ;;  %v840_v14 = vld [vmem:[%s1091_s1 + $0x60] ss:$8 sps:$4 sm:$0xff]   ;;  %v841_v15 = vld [vmem:[%s1091_s1 + $0x74] ss:$8 sps:$4 sm:$0xff]  }
   0x6   :  { %v843_v16 = vld [vmem:[%s1091_s1 + $0x70] ss:$8 sps:$4 sm:$0xff]   ;;  %v844_v17 = vld [vmem:[%s1092_s0] sm:$0xff]   ;;  %v845_v19 = vld [vmem:[%s1092_s0 + $0x8] sm:$0xff]  }
   0x7   :  { %178 = vmatpush1.bf16.msra.mxu0 %v825_v4  ;;  %811 = vmatpush1.bf16.msra.mxu1 %v825_v4  ;;  %v846_v18 = vld [vmem:[%s1092_s0 + $0x20] sm:$0xff]   ;;  %v848_v20 = vld [vmem:[%s1092_s0 + $0x28] sm:$0xff]   ;;  %v847_v21 = vld [vmem:[%s1092_s0 + $0x10] sm:$0xff]  }
   0x8   :  { %179 = vmatprep.subr.bf16.mxu0 %v826_v5  ;;  %804 = vmatprep.subr.bf16.mxu1 %v826_v5  ;;  %v850_v22 = vld [vmem:[%s1092_s0 + $0x30] sm:$0xff]   ;;  %v849_v23 = vld [vmem:[%s1092_s0 + $0x18] sm:$0xff]  }
   0x9   :  { %v851_v24 = vld [vmem:[%s1092_s0 + $0x38] sm:$0xff]  }
   0xb   :  { %180 = vmatpush1.bf16.msra.mxu0 %v828_v6  ;;  %812 = vmatpush1.bf16.msra.mxu1 %v828_v6 }
   0xc   :  { %181 = vmatprep.subr.bf16.mxu0 %v829_v7  ;;  %805 = vmatprep.subr.bf16.mxu1 %v829_v7 }
   0xf   :  { %182 = vmatpush1.bf16.msra.mxu0 %v831_v8  ;;  %813 = vmatpush1.bf16.msra.mxu1 %v831_v8 }
  0x10   :  { %183 = vmatprep.subr.bf16.mxu0 %v832_v9  ;;  %806 = vmatprep.subr.bf16.mxu1 %v832_v9 }
  0x13   :  { %184 = vmatpush1.bf16.msra.mxu0 %v834_v10  ;;  %814 = vmatpush1.bf16.msra.mxu1 %v834_v10 }
  0x14   :  { %185 = vmatprep.subr.bf16.mxu0 %v835_v11  ;;  %807 = vmatprep.subr.bf16.mxu1 %v835_v11 }
  0x17   :  { %186 = vmatpush1.bf16.msra.mxu0 %v837_v12  ;;  %815 = vmatpush1.bf16.msra.mxu1 %v837_v12 }
  0x18   :  { %187 = vmatprep.subr.bf16.mxu0 %v838_v13  ;;  %808 = vmatprep.subr.bf16.mxu1 %v838_v13 }
  0x1b   :  { %188 = vmatpush1.bf16.msra.mxu0 %v840_v14  ;;  %816 = vmatpush1.bf16.msra.mxu1 %v840_v14 }
  0x1c   :  { %189 = vmatprep.subr.bf16.mxu0 %v841_v15  ;;  %809 = vmatprep.subr.bf16.mxu1 %v841_v15 }
  0x1f   :  { %190 = vmatpush1.bf16.msra.mxu0 %v843_v16  ;;  %817 = vmatpush1.bf16.msra.mxu1 %v843_v16 }
  0x22   :  { %208 = vmatmul.mubr.bf16.vlgmr.msra.gmra.mrb[0].mxu0 %v844_v17  ;;  %248 = vmatmul.mubr.bf16.vlgmr.msra.gmra.mrb[0].mxu1 %v846_v18 }
  0x23   :  { %217 = vmatprep.mubr.bf16.mxu0 %v852_v1  ;;  %257 = vmatprep.mubr.bf16.mxu1 %v852_v1 }
  0x2a   :  { %218 = vmatmul.mubr.bf16.gmra.mrb[4].mxu0 %v845_v19  ;;  %258 = vmatmul.mubr.bf16.gmra.mrb[4].mxu1 %v848_v20 }
  0x2b   :  { %227 = vmatprep.mubr.bf16.mxu0 %v852_v1  ;;  %267 = vmatprep.mubr.bf16.mxu1 %v852_v1 }
  0x32   :  { %228 = vmatmul.mubr.bf16.gmra.mrb[8].mxu0 %v847_v21  ;;  %268 = vmatmul.mubr.bf16.gmra.mrb[8].mxu1 %v850_v22 }
  0x33   :  { %237 = vmatprep.mubr.bf16.mxu0 %v852_v1  ;;  %277 = vmatprep.mubr.bf16.mxu1 %v852_v1 }
  0x3a   :  { %238 = vmatmul.mubr.bf16.gmra.mrb[12].mxu0 %v849_v23  ;;  %278 = vmatmul.mubr.bf16.gmra.mrb[12].mxu1 %v851_v24 }
  0xf5   :  { %v209_v25 = vpop.f32.mrb[0].mxu0  ;;  %v959_v26 = vpop.f32.mrb[0].mxu1 }
  0xf6   :  { %v211_v27 = vpop.f32.mrb[1].mxu0  ;;  %v961_v28 = vpop.f32.mrb[1].mxu1  ;;  %v513_v29 = vmul.f32 %v209_v25, %v209_v25 }
  0xf7   :  { %v213_v30 = vpop.f32.mrb[2].mxu0  ;;  %v963_v31 = vpop.f32.mrb[2].mxu1  ;;  %v514_v38 = vmul.f32 %v211_v27, %v211_v27 }
  0xf8   :  { %v711_v32 = vpack.c.bf16 %v213_v30, %v209_v25  ;;  %v448_v33 = vadd.f32 %v213_v30, %v209_v25  ;;  %v515_v34 = vmul.f32 %v213_v30, %v213_v30  ;;  %v215_v35 = vpop.f32.mrb[3].mxu0  ;;  %v731_v36 = vpack.c.bf16 %v963_v31, %v959_v26  ;;  %v967_v37 = vpop.f32.mrb[3].mxu1 }
  0xf9   :  { %v751_v39 = vpack.c.bf16 %v215_v35, %v211_v27  ;;  %v469_v40 = vadd.f32 %v215_v35, %v211_v27  ;;  %v516_v41 = vmul.f32 %v215_v35, %v215_v35  ;;  %v771_v43 = vpack.c.bf16 %v967_v37, %v961_v28 }
  0xfa   :  { %712 = vst [vmem:[%s1093_s2] sm:$0xff] %v711_v32   ;;  %v545_v42 = vadd.f32 %v515_v34, %v513_v29  ;;  %791 = vst [vmem:[%s1093_s2 + $0x20] sm:$0xff] %v731_v36  }
  0xfb   :  { %752 = vst [vmem:[%s1094_s3] sm:$0xff] %v751_v39   ;;  %v566_v44 = vadd.f32 %v516_v41, %v514_v38  ;;  %798 = vst [vmem:[%s1094_s3 + $0x20] sm:$0xff] %v771_v43  }
  0xfd   :  { %v219_v45 = vpop.f32.mrb[4].mxu0  ;;  %v983_v46 = vpop.f32.mrb[4].mxu1 }
  0xfe   :  { %v449_v47 = vadd.f32 %v448_v33, %v219_v45  ;;  %v517_v48 = vmul.f32 %v219_v45, %v219_v45  ;;  %v221_v49 = vpop.f32.mrb[5].mxu0  ;;  %v985_v50 = vpop.f32.mrb[5].mxu1 }
  0xff   :  { %v470_v51 = vadd.f32 %v469_v40, %v221_v49  ;;  %v518_v52 = vmul.f32 %v221_v49, %v221_v49  ;;  %v223_v53 = vpop.f32.mrb[6].mxu0  ;;  %v987_v54 = vpop.f32.mrb[6].mxu1 }
 0x100   :  { %v546_v55 = vadd.f32 %v545_v42, %v517_v48  ;;  %v716_v56 = vpack.c.bf16 %v223_v53, %v219_v45  ;;  %v450_v57 = vadd.f32 %v449_v47, %v223_v53  ;;  %v519_v58 = vmul.f32 %v223_v53, %v223_v53  ;;  %v225_v59 = vpop.f32.mrb[7].mxu0  ;;  %v989_v60 = vpop.f32.mrb[7].mxu1 }
 0x101   :  { %v567_v61 = vadd.f32 %v566_v44, %v518_v52  ;;  %v756_v62 = vpack.c.bf16 %v225_v59, %v221_v49  ;;  %v471_v63 = vadd.f32 %v470_v51, %v225_v59  ;;  %v520_v0 = vmul.f32 %v225_v59, %v225_v59 }
 0x102   :  { %788 = vst [vmem:[%s1093_s2 + $0x8] sm:$0xff] %v716_v56   ;;  %v547_v1 = vadd.f32 %v546_v55, %v519_v58  ;;  %v736_v2 = vpack.c.bf16 %v987_v54, %v983_v46  ;;  %v776_v3 = vpack.c.bf16 %v989_v60, %v985_v50  ;;  %v529_v56 = vmul.f32 %v959_v26, %v959_v26 }
 0x103   :  { %795 = vst [vmem:[%s1094_s3 + $0x8] sm:$0xff] %v756_v62   ;;  %v568_v4 = vadd.f32 %v567_v61, %v520_v0  ;;  %v530_v61 = vmul.f32 %v961_v28, %v961_v28 }
 0x104   :  { %792 = vst [vmem:[%s1093_s2 + $0x28] sm:$0xff] %v736_v2   ;;  %799 = vst [vmem:[%s1094_s3 + $0x28] sm:$0xff] %v776_v3   ;;  %v532_v3 = vmul.f32 %v967_v37, %v967_v37 }
 0x105   :  { %v229_v5 = vpop.f32.mrb[8].mxu0  ;;  %v1007_v6 = vpop.f32.mrb[8].mxu1 }
 0x106   :  { %v451_v7 = vadd.f32 %v450_v57, %v229_v5  ;;  %v521_v8 = vmul.f32 %v229_v5, %v229_v5  ;;  %v231_v9 = vpop.f32.mrb[9].mxu0  ;;  %v1009_v10 = vpop.f32.mrb[9].mxu1 }
 0x107   :  { %v472_v11 = vadd.f32 %v471_v63, %v231_v9  ;;  %v522_v12 = vmul.f32 %v231_v9, %v231_v9  ;;  %v233_v13 = vpop.f32.mrb[10].mxu0  ;;  %v1011_v14 = vpop.f32.mrb[10].mxu1 }
 0x108   :  { %v548_v15 = vadd.f32 %v547_v1, %v521_v8  ;;  %v721_v16 = vpack.c.bf16 %v233_v13, %v229_v5  ;;  %v452_v17 = vadd.f32 %v451_v7, %v233_v13  ;;  %v523_v18 = vmul.f32 %v233_v13, %v233_v13  ;;  %v235_v19 = vpop.f32.mrb[11].mxu0  ;;  %v1013_v20 = vpop.f32.mrb[11].mxu1 }
 0x109   :  { %v569_v21 = vadd.f32 %v568_v4, %v522_v12  ;;  %v761_v22 = vpack.c.bf16 %v235_v19, %v231_v9  ;;  %v473_v23 = vadd.f32 %v472_v11, %v235_v19  ;;  %v524_v24 = vmul.f32 %v235_v19, %v235_v19 }
 0x10a   :  { %789 = vst [vmem:[%s1093_s2 + $0x10] sm:$0xff] %v721_v16   ;;  %v549_v25 = vadd.f32 %v548_v15, %v523_v18  ;;  %v741_v27 = vpack.c.bf16 %v1011_v14, %v1007_v6  ;;  %v781_v29 = vpack.c.bf16 %v1013_v20, %v1009_v10  ;;  %v531_v1 = vmul.f32 %v963_v31, %v963_v31 }
 0x10b   :  { %796 = vst [vmem:[%s1094_s3 + $0x10] sm:$0xff] %v761_v22   ;;  %v570_v30 = vadd.f32 %v569_v21, %v524_v24  ;;  %v534_v8 = vmul.f32 %v985_v50, %v985_v50  ;;  %v536_v15 = vmul.f32 %v989_v60, %v989_v60  ;;  %v537_v18 = vmul.f32 %v1007_v6, %v1007_v6 }
 0x10c   :  { %793 = vst [vmem:[%s1093_s2 + $0x30] sm:$0xff] %v741_v27   ;;  %800 = vst [vmem:[%s1094_s3 + $0x30] sm:$0xff] %v781_v29   ;;  %v538_v21 = vmul.f32 %v1009_v10, %v1009_v10  ;;  %v539_v24 = vmul.f32 %v1011_v14, %v1011_v14 }
 0x10d   :  { %v239_v32 = vpop.f32.mrb[12].mxu0  ;;  %v1031_v33 = vpop.f32.mrb[12].mxu1 }
 0x10e   :  { %v453_v34 = vadd.f32 %v452_v17, %v239_v32  ;;  %v525_v35 = vmul.f32 %v239_v32, %v239_v32  ;;  %v241_v36 = vpop.f32.mrb[13].mxu0  ;;  %v281_v38 = vpop.f32.mrb[13].mxu1 }
 0x10f   :  { %v474_v39 = vadd.f32 %v473_v23, %v241_v36  ;;  %v526_v40 = vmul.f32 %v241_v36, %v241_v36  ;;  %v243_v41 = vpop.f32.mrb[14].mxu0  ;;  %v283_v42 = vpop.f32.mrb[14].mxu1  ;;  %v542_v29 = vmul.f32 %v281_v38, %v281_v38 }
 0x110   :  { %v550_v43 = vadd.f32 %v549_v25, %v525_v35  ;;  %v726_v44 = vpack.c.bf16 %v243_v41, %v239_v32  ;;  %v454_v45 = vadd.f32 %v453_v34, %v243_v41  ;;  %v527_v47 = vmul.f32 %v243_v41, %v243_v41  ;;  %v245_v48 = vpop.f32.mrb[15].mxu0  ;;  %v285_v49 = vpop.f32.mrb[15].mxu1 }
 0x111   :  { %v571_v51 = vadd.f32 %v570_v30, %v526_v40  ;;  %v766_v52 = vpack.c.bf16 %v245_v48, %v241_v36  ;;  %v475_v53 = vadd.f32 %v474_v39, %v245_v48  ;;  %v528_v55 = vmul.f32 %v245_v48, %v245_v48 }
 0x112   :  { %790 = vst [vmem:[%s1093_s2 + $0x18] sm:$0xff] %v726_v44   ;;  %v455_v57 = vadd.f32 %v454_v45, %v959_v26  ;;  %v551_v58 = vadd.f32 %v550_v43, %v527_v47  ;;  %v746_v59 = vpack.c.bf16 %v283_v42, %v1031_v33  ;;  %v786_v0 = vpack.c.bf16 %v285_v49, %v281_v38 }
 0x113   :  { %797 = vst [vmem:[%s1094_s3 + $0x18] sm:$0xff] %v766_v52   ;;  %v476_v62 = vadd.f32 %v475_v53, %v961_v28  ;;  %v572_v63 = vadd.f32 %v571_v51, %v528_v55  ;;  %v533_v28 = vmul.f32 %v983_v46, %v983_v46  ;;  %v543_v39 = vmul.f32 %v283_v42, %v283_v42 }
 0x114   :  { %v456_v2 = vadd.f32 %v455_v57, %v963_v31  ;;  %v552_v26 = vadd.f32 %v551_v58, %v529_v56  ;;  %794 = vst [vmem:[%s1093_s2 + $0x38] sm:$0xff] %v746_v59   ;;  %801 = vst [vmem:[%s1094_s3 + $0x38] sm:$0xff] %v786_v0   ;;  %v544_v41 = vmul.f32 %v285_v49, %v285_v49  ;;  %v496_v55 = vlaneseq }
 0x115   :  { %v477_v4 = vadd.f32 %v476_v62, %v967_v37  ;;  %v573_v5 = vadd.f32 %v572_v63, %v530_v61  ;;  %v535_v37 = vmul.f32 %v987_v54, %v987_v54 }
 0x116   :  { %v553_v7 = vadd.f32 %v552_v26, %v531_v1  ;;  %v457_v31 = vadd.f32 %v456_v2, %v983_v46  ;;  %vm510_vm0 = vcmp.lt.s32.totalorder %v496_v55, 256 }
 0x117   :  { %v574_v9 = vadd.f32 %v573_v5, %v532_v3  ;;  %v478_v11 = vadd.f32 %v477_v4, %v985_v50 }
 0x118   :  { %v458_v12 = vadd.f32 %v457_v31, %v987_v54  ;;  %v554_v13 = vadd.f32 %v553_v7, %v533_v28 }
 0x119   :  { %v479_v16 = vadd.f32 %v478_v11, %v989_v60  ;;  %v575_v17 = vadd.f32 %v574_v9, %v534_v8  ;;  %v541_v60 = vmul.f32 %v1031_v33, %v1031_v33 }
 0x11a   :  { %v459_v46 = vadd.f32 %v458_v12, %v1007_v6  ;;  %v555_v19 = vadd.f32 %v554_v13, %v535_v37  ;;  %v540_v6 = vmul.f32 %v1013_v20, %v1013_v20 }
 0x11b   :  { %v480_v50 = vadd.f32 %v479_v16, %v1009_v10  ;;  %v576_v22 = vadd.f32 %v575_v17, %v536_v15 }
 0x11c   :  { %v556_v54 = vadd.f32 %v555_v19, %v537_v18  ;;  %v460_v23 = vadd.f32 %v459_v46, %v1011_v14 }
 0x11d   :  { %v577_v25 = vadd.f32 %v576_v22, %v538_v21  ;;  %v481_v27 = vadd.f32 %v480_v50, %v1013_v20  ;;  %v853_v20 = vmov 1966171168  }
 0x11e   :  { %v557_v30 = vadd.f32 %v556_v54, %v539_v24  ;;  %v461_v10 = vadd.f32 %v460_v23, %v1031_v33  ;;  %v494_v53 = vunpack.c.l.s4 %v853_v20 }
 0x11f   :  { %v578_v32 = vadd.f32 %v577_v25, %v540_v6  ;;  %v482_v34 = vadd.f32 %v481_v27, %v281_v38 }
 0x120   :  { %v558_v35 = vadd.f32 %v557_v30, %v541_v60  ;;  %v462_v36 = vadd.f32 %v461_v10, %v283_v42  ;;  %v495_v62 = vunpack.c.0.s8 %v494_v53 }
 0x121   :  { %v579_v40 = vadd.f32 %v578_v32, %v542_v29  ;;  %v483_v14 = vadd.f32 %v482_v34, %v285_v49  ;;  %v497_v49 = vshrl.u32 %v496_v55, 7 }
 0x122   :  { %v463_v43 = vrot.slane %v462_v36, 4  ;;  %v559_v44 = vadd.f32 %v558_v35, %v543_v39 }
 0x123   :  { %v484_v45 = vrot.slane %v483_v14, 4  ;;  %v580_v47 = vadd.f32 %v579_v40, %v544_v41  ;;  %v498_v28 = vsub.s32 %v495_v62, %v497_v49 }
 0x124   :  { %v464_v48 = vadd.f32 %v463_v43, %v462_v36  ;;  %v560_v51 = vrot.slane %v559_v44, 4 }
 0x125   :  { %v485_v52 = vadd.f32 %v484_v45, %v483_v14  ;;  %v581_v56 = vrot.slane %v580_v47, 4 }
 0x126   :  { %v465_v33 = vrot.slane %v464_v48, 2  ;;  %v561_v57 = vadd.f32 %v560_v51, %v559_v44 }
 0x127   :  { %v486_v38 = vrot.slane %v485_v52, 2  ;;  %v582_v58 = vadd.f32 %v581_v56, %v580_v47 }
 0x128   :  { %v466_v59 = vadd.f32 %v465_v33, %v464_v48  ;;  %v562_v42 = vrot.slane %v561_v57, 2 }
 0x129   :  { %v487_v61 = vadd.f32 %v486_v38, %v485_v52  ;;  %v583_v63 = vrot.slane %v582_v58, 2 }
 0x12a   :  { %v467_v0 = vrot.slane %v466_v59, 1  ;;  %v563_v1 = vadd.f32 %v562_v42, %v561_v57 }
 0x12b   :  { %v488_v2 = vrot.slane %v487_v61, 1  ;;  %v584_v26 = vadd.f32 %v583_v63, %v582_v58 }
 0x12c   :  { %v468_v3 = vadd.f32 %v467_v0, %v466_v59  ;;  %v564_v4 = vrot.slane %v563_v1, 1 }
 0x12d   :  { %v489_v5 = vadd.f32 %v488_v2, %v487_v61  ;;  %v585_v7 = vrot.slane %v584_v26, 1 }
 0x12e   :  { %v565_v31 = vadd.f32 %v564_v4, %v563_v1 }
 0x12f   :  { %v492_v8 = vcombine.low %v468_v3, %v489_v5  ;;  %v586_v9 = vadd.f32 %v585_v7, %v584_v26 }
 0x131   :  { %v499_v11 = vrot.slane %v492_v8, %v498_v28  ;;  %v589_v37 = vcombine.low %v565_v31, %v586_v9 }
 0x133   :  { %v506_v12 = vrot.slane %v499_v11, %v498_v28  ;;  %v596_v13 = vrot.slane %v589_v37, %v498_v28 }
 0x135   :  { %512 = vst.msk [vmem:[%s1095_s4] ss:$2 sm:$0x3] %vm510_vm0, %v506_v12  ;;  %v603_v15 = vrot.slane %v596_v13, %v498_v28 }
 0x137   :  { %675 = vst.msk [vmem:[%s1095_s4 + $0x1] ss:$2 sm:$0x3] %vm510_vm0, %v603_v15 }

// kernel: conv_block_forward.4
= control target key start
LH: loop header
LB: loop body
LE: loop exit
PB: predicated region body
PF: predicated region fallthrough
CT: control target
= control target key end

     0   :  { %s3241_s18 = smov 0   ;;  %s3736_s0 = inlined_call_operand.vmem [shape: bf16[128,128], index: 0, kind: input, shape index: {}]   ;;  %s3737_s1 = inlined_call_operand.vmem [shape: bf16[3,3,128,128], index: 1, kind: input, shape index: {}]   ;;  %s3738_s2 = inlined_call_operand.vmem [shape: f32[1,128], index: 2, kind: input, shape index: {}]   ;;  %s3739_s3 = inlined_call_operand.vmem [shape: f32[1,128], index: 3, kind: input, shape index: {}]   ;;  %s3740_s4 = inlined_call_operand.vmem [shape: bf16[128,128], index: 4, kind: output, shape index: {0}]   ;;  %s3741_s5 = inlined_call_operand.vmem [shape: f32[2,2,128], index: 5, kind: output, shape index: {1}]  }
   0x1 LB: > { %s3247_s19 = sadd.s32 4294967295, %s3208_s18   ;;  %p2391_p0 = scmp.ge.s32.totalorder %s3208_s18, 1  ;;  %s3208_s18 = sphi %s3241_s18, %s16_s18  }
   0x2   : > { %p191_p1 = scmp.lt.s32.totalorder %s3208_s18, 3 }
   0x4   : > { %p192_p2 = pnand %p2391_p0, %p191_p1 }
   0x5   : > { %v3125_v0 = vld [vmem:[%s3737_s1] sm:$0xff] (!%p192_p2)   ;;  %s2392_s22 = sshll.u32 (!%p192_p2), %s3247_s19, 3  ;;  %v3126_v1 = vld [vmem:[%s3737_s1 + $0x8] sm:$0xff] (!%p192_p2)   ;;  %v3210_v3 = vmov (!%p192_p2), 0   ;;  %v3127_v4 = vld [vmem:[%s3737_s1 + $0x10] sm:$0xff] (!%p192_p2)   ;;  %vm419_vm0 = vcmask (!%p192_p2), 1043456  }
   0x6   : > { %195 = sbr.rel (%p192_p2) target bundleno = 436 (0x1b4), region = 36  ;;  %p3258_p3 = scmp.lt.s32.totalorder (!%p192_p2), %s2392_s22, 15  ;;  %2820 = vmatprep.subr.bf16.mxu1 (!%p192_p2), %v3125_v0  ;;  %v3128_v2 = vld [vmem:[%s3737_s1 + $0x100] sm:$0xff] (!%p192_p2)   ;;  %294 = vst [vmem:[#allocation2] sm:$0xf] (!%p192_p2), %v3210_v3  ;;  %v3130_v5 = vld [vmem:[%s3737_s1 + $0x108] sm:$0xff] (!%p192_p2)  }
   0x7   : > { %2821 = vmatpush3.bf16.msra.mxu1 (!%p192_p2), %v3125_v0  ;;  %296 = vst [vmem:[#allocation2 + $0x8] sm:$0xf] (!%p192_p2), %v3210_v3  ;;  %298 = vst [vmem:[#allocation2 + $0x10] sm:$0xf] (!%p192_p2), %v3210_v3  ;;  %2916 = vmatprep.subr.bf16.mxu0 (!%p192_p2), %v3128_v2  ;;  %v3132_v6 = vld [vmem:[%s3737_s1 + $0x110] sm:$0xff] (!%p192_p2)   ;;  %v3129_v7 = vld [vmem:[%s3737_s1 + $0x18] sm:$0xff] (!%p192_p2)  }
   0x8   : > { %295 = vst [vmem:[#allocation2 + $0x4] sm:$0x1] (!%p192_p2), %v3210_v3  ;;  %297 = vst [vmem:[#allocation2 + $0xc] sm:$0x1] (!%p192_p2), %v3210_v3  ;;  %2822 = vmatprep.subr.bf16.mxu1 (!%p192_p2), %v3126_v1  ;;  %2917 = vmatpush3.bf16.msra.mxu0 (!%p192_p2), %v3128_v2  ;;  %v3134_v8 = vld [vmem:[%s3737_s1 + $0x118] sm:$0xff] (!%p192_p2)   ;;  %v3131_v9 = vld [vmem:[%s3737_s1 + $0x20] sm:$0xff] (!%p192_p2)  }
   0x9   : > { %299 = vst [vmem:[#allocation2 + $0x14] sm:$0x1] (!%p192_p2), %v3210_v3  ;;  %300 = vst [vmem:[#allocation2 + $0x18] sm:$0xf] (!%p192_p2), %v3210_v3  ;;  %2918 = vmatprep.subr.bf16.mxu0 (!%p192_p2), %v3130_v5  ;;  %v3299_v11 = vld [vmem:[%s3738_s2] ss:$0 sm:$0xff] (!%p192_p2) }
   0xa   : > { %301 = vst [vmem:[#allocation2 + $0x1c] sm:$0x1] (!%p192_p2), %v3210_v3  ;;  %302 = vst [vmem:[#allocation2 + $0x20] sm:$0xf] (!%p192_p2), %v3210_v3  ;;  %v3136_v12 = vld [vmem:[%s3737_s1 + $0x120] sm:$0xff] (!%p192_p2)   ;;  %v3133_v15 = vld [vmem:[%s3737_s1 + $0x28] sm:$0xff] (!%p192_p2)  }
   0xb   : > { %303 = vst [vmem:[#allocation2 + $0x24] sm:$0x1] (!%p192_p2), %v3210_v3  ;;  %304 = vst [vmem:[#allocation2 + $0x28] sm:$0xf] (!%p192_p2), %v3210_v3  ;;  %2823 = vmatpush3.bf16.msra.mxu1 (!%p192_p2), %v3126_v1  ;;  %v3310_v16 = vld [vmem:[%s3739_s3] ss:$0 sm:$0xff] (!%p192_p2) }
   0xc   : > { %305 = vst [vmem:[#allocation2 + $0x2c] sm:$0x1] (!%p192_p2), %v3210_v3  ;;  %306 = vst [vmem:[#allocation2 + $0x30] sm:$0xf] (!%p192_p2), %v3210_v3  ;;  %2824 = vmatprep.subr.bf16.mxu1 (!%p192_p2), %v3127_v4  ;;  %2919 = vmatpush3.bf16.msra.mxu0 (!%p192_p2), %v3130_v5  ;;  %v3138_v22 = vld [vmem:[%s3737_s1 + $0x128] sm:$0xff] (!%p192_p2)   ;;  %v3135_v25 = vld [vmem:[%s3737_s1 + $0x30] sm:$0xff] (!%p192_p2)  }
   0xd   : > { %307 = vst [vmem:[#allocation2 + $0x34] sm:$0x1] %v3210_v3  ;;  %308 = vst [vmem:[#allocation2 + $0x38] sm:$0xf] %v3210_v3  ;;  %s3752_s22 = smov (!%p3258_p3, %s2392_s22), 15  ;;  %2920 = vmatprep.subr.bf16.mxu0 %v3132_v6  ;;  %vm425_vm1 = vcmask 1040384  }
   0xe   : > { %309 = vst [vmem:[#allocation2 + $0x3c] sm:$0x1] %v3210_v3  ;;  %310 = vst [vmem:[#allocation2 + $0x40] sm:$0xf] %v3210_v3  ;;  %s2393_s11 = sshll.u32 %s3752_s22, 2  ;;  %v3142_v33 = vld [vmem:[%s3737_s1 + $0x130] sm:$0xff]  }
   0xf   : > { %311 = vst [vmem:[#allocation2 + $0x44] sm:$0x1] %v3210_v3  ;;  %312 = vst [vmem:[#allocation2 + $0x48] sm:$0xf] %v3210_v3  ;;  %2825 = vmatpush3.bf16.msra.mxu1 %v3127_v4  ;;  %s3290_s16 = scalar_lea.vmem %s3736_s0, %s2393_s11  ;;  %vm420_vm2 = vsmask.f32 7938  ;;  %s233_s28 = scalar_lea.vmem %s3740_s4, %s2393_s11 }
  0x10   : > { %313 = vst [vmem:[#allocation2 + $0x4c] sm:$0x1] %v3210_v3  ;;  %2826 = vmatprep.subr.bf16.mxu1 %v3129_v7  ;;  %2921 = vmatpush3.bf16.msra.mxu0 %v3132_v6  ;;  %v2671_v10 = vld [vmem:[%s3290_s16] sm:$0xff]   ;;  %v2706_v19 = vld [vmem:[%s3290_s16 + $0x8] sm:$0xff]   ;;  %v3137_v36 = vld [vmem:[%s3737_s1 + $0x38] sm:$0xff]   ;;  %vm1679_vm9 = vcmask 1042432  }
  0x11   : > { %2922 = vmatprep.subr.bf16.mxu0 %v3134_v8  ;;  %v2672_v13 = vunpack.c.l.bf16 %v2671_v10  ;;  %v2673_v14 = vunpack.c.h.bf16 %v2671_v10  ;;  %v2676_v20 = vunpack.c.l.bf16 %v2706_v19  ;;  %v2677_v21 = vunpack.c.h.bf16 %v2706_v19  ;;  %v990_v34 = vld [vmem:[#allocation2] sm:$0xf]  ;;  %v422_v44 = vld [vmem:[#allocation2 + $0x8] sm:$0xf]  ;;  %v431_v45 = vld [vmem:[#allocation2 + $0x10] sm:$0xf] }
  0x12   : > { %vm426_vm3 = vsmask.f32 256  ;;  %v1014_v38 = vshrl.u32 %v990_v34, 16  ;;  %v1017_v39 = vshll.u32 %v990_v34, 16  ;;  %v3336_v46 = vld [vmem:[%s3737_s1 + $0xc0] sm:$0xff]   ;;  %vm3340_vm4 = vmand %vm419_vm0, %vm420_vm2  ;;  %v3144_v52 = vld [vmem:[%s3737_s1 + $0x138] sm:$0xff]  }
  0x13   : > { %2827 = vmatpush3.bf16.msra.mxu1 %v3129_v7  ;;  %v263_v17 = vmul.f32 %v2672_v13, %v3299_v11  ;;  %v264_v18 = vmul.f32 %v2673_v14, %v3299_v11  ;;  %v265_v26 = vmul.f32 %v2676_v20, %v3299_v11  ;;  %v266_v27 = vmul.f32 %v2677_v21, %v3299_v11  ;;  %v428_v48 = vld [vmem:[#allocation2 + $0xc] sm:$0x1]  ;;  %v991_v53 = vld [vmem:[#allocation2 + $0x4] sm:$0x1]  ;;  %vm3349_vm5 = vmand %vm425_vm1, %vm426_vm3  ;;  %p235_p4 = scmp.lt.s32.totalorder %s3247_s19, 1 }
  0x14   : > { %2828 = vmatprep.subr.bf16.mxu1 %v3131_v9  ;;  %2923 = vmatpush3.bf16.msra.mxu0 %v3134_v8  ;;  %v434_v58 = vld [vmem:[#allocation2 + $0x14] sm:$0x1]  ;;  %v1016_v59 = vrot.slane %v1014_v38, 4  ;;  %v1019_v60 = vrot.slane %v1017_v39, 5  ;;  %v437_v0 = vld [vmem:[#allocation2 + $0x18] sm:$0xf] }
  0x15   : > { %2924 = vmatprep.subr.bf16.mxu0 %v3136_v12  ;;  %v278_v23 = vadd.f32 %v3310_v16, %v263_v17  ;;  %v279_v24 = vadd.f32 %v3310_v16, %v264_v18  ;;  %v280_v30 = vadd.f32 %v3310_v16, %v265_v26  ;;  %v281_v35 = vadd.f32 %v3310_v16, %v266_v27  ;;  %v440_v2 = vld [vmem:[#allocation2 + $0x1c] sm:$0x1]  ;;  %v3356_v3 = vld [vmem:[%s3737_s1 + $0x1c0] sm:$0xff]   ;;  %v2707_v20 = vld [vmem:[%s3290_s16 + $0x10] sm:$0xff]   ;;  %s3754_s19 = smov (!%p235_p4, %s3247_s19), 1 }
  0x16   : > { %vm1010_vm6 = vsmask.f32 3328  ;;  %v1023_v5 = vshll.u32 %v991_v53, 16  ;;  %v1020_v14 = vor.u32 %v1019_v60, %v1016_v59  ;;  %vm1011_vm7 = vsmask.f32 7440  ;;  %s2396_s22 = sshll.u32 %s3754_s19, 1 }
  0x17   : > { %2829 = vmatpush3.bf16.msra.mxu1 %v3131_v9  ;;  %v286_v28 = vmax.f32 %v278_v23, 0.0  ;;  %v287_v29 = vmax.f32 %v279_v24, 0.0  ;;  %v288_v37 = vmax.f32 %v280_v30, 0.0  ;;  %v289_v54 = vmax.f32 %v281_v35, 0.0  ;;  %v443_v23 = vld [vmem:[#allocation2 + $0x20] sm:$0xf]  ;;  %vm3393_vm8 = vmor %vm1010_vm6, %vm1011_vm7  ;;  %s238_s30 = scalar_lea.vmem %s3741_s5, %s2396_s22 }
  0x18   : > { %2830 = vmatprep.subr.bf16.mxu1 %v3133_v15  ;;  %2925 = vmatpush3.bf16.msra.mxu0 %v3136_v12  ;;  %v3372_v21 = vrot.slane %v1023_v5, 5  ;;  %v2680_v24 = vunpack.c.l.bf16 %v2707_v20  ;;  %v3375_v26 = vrot.slane %v1020_v14, 4  ;;  %v446_v27 = vld [vmem:[#allocation2 + $0x24] sm:$0x1]  ;;  %vm1680_vm10 = vcmask 1046532  }
  0x19   : > { %2926 = vmatprep.subr.bf16.mxu0 %v3138_v22  ;;  %v2654_v31 = vpack.c.bf16 %v286_v28, %v286_v28  ;;  %v2655_v32 = vpack.c.bf16 %v287_v29, %v287_v29  ;;  %v2656_v47 = vpack.c.bf16 %v288_v37, %v288_v37  ;;  %v2657_v6 = vpack.c.bf16 %v289_v54, %v289_v54  ;;  %v2708_v28 = vld [vmem:[%s3290_s16 + $0x18] sm:$0xff]   ;;  %v481_v29 = vld [vmem:[#allocation2] sm:$0xf]  ;;  %vm3562_vm11 = vmor %vm1679_vm9, %vm1680_vm10 }
  0x1a   : > { %v2685_v34 = vunpack.c.h.bf16 %v2708_v28 }
  0x1b   : > { %2831 = vmatpush3.bf16.msra.mxu1 %v3133_v15  ;;  %v339_v40 = vshrl.u32 %v2654_v31, 16  ;;  %v342_v41 = vshll.u32 %v2654_v31, 16  ;;  %v347_v42 = vshrl.u32 %v2655_v32, 16  ;;  %v350_v43 = vshll.u32 %v2655_v32, 16 }
  0x1c   : > { %2832 = vmatprep.subr.bf16.mxu1 %v3135_v25  ;;  %2927 = vmatpush3.bf16.msra.mxu0 %v3138_v22  ;;  %v355_v55 = vshrl.u32 %v2656_v47, 16  ;;  %v358_v56 = vshll.u32 %v2656_v47, 16  ;;  %v363_v15 = vshrl.u32 %v2657_v6, 16  ;;  %v366_v17 = vshll.u32 %v2657_v6, 16 }
  0x1d   : > { %v341_v49 = vrot.slane %v339_v40, 7  ;;  %v349_v50 = vrot.slane %v347_v42, 7  ;;  %2928 = vmatprep.subr.bf16.mxu0 %v3142_v33  ;;  %v267_v32 = vmul.f32 %v2680_v24, %v3299_v11 }
  0x1e   : > { %v357_v4 = vrot.slane %v355_v55, 7  ;;  %v365_v22 = vrot.slane %v363_v15, 7 }
  0x1f   : > { %2833 = vmatpush3.bf16.msra.mxu1 %v3135_v25  ;;  %v344_v61 = vor.u32 %v342_v41, %v341_v49  ;;  %v345_v62 = vrot.slane %v341_v49, 4  ;;  %v352_v63 = vor.u32 %v350_v43, %v349_v50  ;;  %v353_v1 = vrot.slane %v349_v50, 4 }
  0x20   : > { %2834 = vmatprep.subr.bf16.mxu1 %v3137_v36  ;;  %2929 = vmatpush3.bf16.msra.mxu0 %v3142_v33  ;;  %v360_v10 = vor.u32 %v358_v56, %v357_v4  ;;  %v361_v12 = vrot.slane %v357_v4, 4  ;;  %v2681_v25 = vunpack.c.h.bf16 %v2707_v20  ;;  %v368_v30 = vor.u32 %v366_v17, %v365_v22  ;;  %v3145_v17 = vld [vmem:[%s3737_s1 + $0xd0] sm:$0xff]  }
  0x21   : > { %v423_v7 = vsel %vm3340_vm4, %v344_v61, %v422_v44  ;;  %v432_v8 = vsel %vm3340_vm4, %v352_v63, %v431_v45  ;;  %2930 = vmatprep.subr.bf16.mxu0 %v3144_v52  ;;  %v429_v9 = vsel %vm3349_vm5, %v345_v62, %v428_v48  ;;  %v435_v13 = vsel %vm3349_vm5, %v353_v1, %v434_v58  ;;  %v3143_v63 = vld [vmem:[%s3737_s1 + $0xc8] sm:$0xff]   ;;  %v3171_v48 = vld [vmem:[%s3737_s1 + $0x1b0] sm:$0xff]  }
  0x22   : > { %424 = vst [vmem:[#allocation2 + $0x8] sm:$0xf] %v423_v7  ;;  %433 = vst [vmem:[#allocation2 + $0x10] sm:$0xf] %v432_v8  ;;  %v438_v18 = vsel %vm3340_vm4, %v360_v10, %v437_v0  ;;  %v441_v19 = vsel %vm3349_vm5, %v361_v12, %v440_v2  ;;  %v369_v31 = vrot.slane %v365_v22, 4  ;;  %v2684_v33 = vunpack.c.l.bf16 %v2708_v28 }
  0x23   : > { %2835 = vmatpush3.bf16.msra.mxu1 %v3137_v36  ;;  %430 = vst [vmem:[#allocation2 + $0xc] sm:$0x1] %v429_v9  ;;  %436 = vst [vmem:[#allocation2 + $0x14] sm:$0x1] %v435_v13  ;;  %v268_v35 = vmul.f32 %v2681_v25, %v3299_v11  ;;  %v444_v38 = vsel %vm3340_vm4, %v368_v30, %v443_v23  ;;  %v282_v45 = vadd.f32 %v3310_v16, %v267_v32 }
  0x24   : > { %2844 = vmatprep.subr.bf16.mxu1 %v3336_v46  ;;  %2931 = vmatpush3.bf16.msra.mxu0 %v3144_v52  ;;  %439 = vst [vmem:[#allocation2 + $0x18] sm:$0xf] %v438_v18  ;;  %442 = vst [vmem:[#allocation2 + $0x1c] sm:$0x1] %v441_v19  ;;  %v447_v39 = vsel %vm3349_vm5, %v369_v31, %v446_v27  ;;  %v269_v40 = vmul.f32 %v2684_v33, %v3299_v11 }
  0x25   : > { %2940 = vmatprep.subr.bf16.mxu0 %v3356_v3  ;;  %445 = vst [vmem:[#allocation2 + $0x20] sm:$0xf] %v444_v38  ;;  %448 = vst [vmem:[#allocation2 + $0x24] sm:$0x1] %v447_v39  ;;  %v1026_v58 = vsel %vm3393_vm8, %v3375_v26, %v3372_v21  ;;  %v283_v59 = vadd.f32 %v3310_v16, %v268_v35  ;;  %v270_v61 = vmul.f32 %v2685_v34, %v3299_v11 }
  0x26   : > { %v284_v60 = vadd.f32 %v3310_v16, %v269_v40  ;;  %v290_v10 = vmax.f32 %v282_v45, 0.0  ;;  %v449_v45 = vld [vmem:[#allocation2 + $0x28] sm:$0xf] }
  0x27   : > { %v291_v15 = vmax.f32 %v283_v59, 0.0  ;;  %v285_v40 = vadd.f32 %v3310_v16, %v270_v61 }
  0x28   : > { %v2658_v22 = vpack.c.bf16 %v290_v10, %v290_v10  ;;  %v461_v10 = vld [vmem:[#allocation2 + $0x38] sm:$0xf] }
  0x29   : > { %v3380_v36 = vld [vmem:[#allocation2 + $0x8] sm:$0xf]  ;;  %v3387_v41 = vld [vmem:[#allocation2 + $0x10] sm:$0xf]  ;;  %v2659_v27 = vpack.c.bf16 %v291_v15, %v291_v15 }
  0x2a   : > { %v992_v37 = vld [vmem:[#allocation2 + $0x8] sm:$0xf]  ;;  %v2407_v42 = vcombine.low %v481_v29, %v3380_v36  ;;  %v993_v43 = vld [vmem:[#allocation2 + $0xc] sm:$0x1]  ;;  %v994_v44 = vld [vmem:[#allocation2 + $0x10] sm:$0xf] }
  0x2b   : > { %v995_v47 = vld [vmem:[#allocation2 + $0x14] sm:$0x1]  ;;  %v1028_v49 = vshrl.u32 %v992_v37, 16  ;;  %v1031_v50 = vshll.u32 %v992_v37, 16  ;;  %v1037_v52 = vshll.u32 %v993_v43, 16  ;;  %v1042_v53 = vshrl.u32 %v994_v44, 16 }
  0x2c   : > { %2836 = vmatprep.mubr.bf16.mxu1 %v2407_v42  ;;  %v3397_v54 = vld [vmem:[#allocation2 + $0x18] sm:$0xf]  ;;  %v997_v56 = vld [vmem:[#allocation2 + $0x1c] sm:$0x1]  ;;  %v1045_v5 = vshll.u32 %v994_v44, 16  ;;  %v1051_v6 = vshll.u32 %v995_v47, 16 }
  0x2d   : > { %v996_v55 = vld [vmem:[#allocation2 + $0x18] sm:$0xf]  ;;  %v3408_v62 = vcombine.low %v3387_v41, %v3397_v54  ;;  %v1030_v0 = vrot.slane %v1028_v49, 4  ;;  %v1033_v1 = vrot.slane %v1031_v50, 5  ;;  %v1039_v2 = vrot.slane %v1037_v52, 5  ;;  %v3149_v52 = vld [vmem:[%s3737_s1 + $0xe0] sm:$0xff]  }
  0x2e   : > { %v1044_v4 = vrot.slane %v1042_v53, 4  ;;  %v1056_v7 = vshrl.u32 %v996_v55, 16  ;;  %v1059_v9 = vshll.u32 %v996_v55, 16  ;;  %v1065_v11 = vshll.u32 %v997_v56, 16  ;;  %v998_v21 = vld [vmem:[#allocation2 + $0x20] sm:$0xf] }
  0x2f   : > { %2837 = vmatmul.mubr.bf16.vlgmr.msra.gmra.mrb[0].mxu1 %v3408_v62  ;;  %v1034_v8 = vor.u32 %v1033_v1, %v1030_v0  ;;  %v1047_v12 = vrot.slane %v1045_v5, 5  ;;  %v1053_v13 = vrot.slane %v1051_v6, 5  ;;  %v999_v24 = vld [vmem:[#allocation2 + $0x24] sm:$0x1]  ;;  %v1070_v25 = vshrl.u32 %v998_v21, 16  ;;  %v3147_v37 = vld [vmem:[%s3737_s1 + $0xd8] sm:$0xff]  }
  0x30   : > { %2845 = vmatpush3.bf16.msra.mxu1 %v3336_v46  ;;  %v1058_v14 = vrot.slane %v1056_v7, 4  ;;  %v1061_v19 = vrot.slane %v1059_v9, 5  ;;  %v1067_v20 = vrot.slane %v1065_v11, 5  ;;  %v1073_v26 = vshll.u32 %v998_v21, 16  ;;  %v452_v49 = vld [vmem:[#allocation2 + $0x2c] sm:$0x1] }
  0x31   : > { %2846 = vmatprep.subr.bf16.mxu1 %v3143_v63  ;;  %v1035_v18 = vrot.slane %v1034_v8, 4  ;;  %v1048_v23 = vor.u32 %v1047_v12, %v1044_v4  ;;  %v1079_v29 = vshll.u32 %v999_v24, 16  ;;  %v371_v30 = vshrl.u32 %v2658_v22, 16  ;;  %v458_v1 = vld [vmem:[#allocation2 + $0x34] sm:$0x1]  ;;  %v3148_v5 = vld [vmem:[%s3737_s1 + $0x1c8] sm:$0xff]  }
  0x32   : > { %v1062_v28 = vor.u32 %v1061_v19, %v1058_v14  ;;  %v1072_v33 = vrot.slane %v1070_v25, 4  ;;  %v1075_v34 = vrot.slane %v1073_v26, 5  ;;  %v374_v39 = vshll.u32 %v2658_v22, 16  ;;  %v3151_v11 = vld [vmem:[%s3737_s1 + $0xe8] sm:$0xff]   ;;  %v3150_v21 = vld [vmem:[%s3737_s1 + $0x1d0] sm:$0xff]  }
  0x33   : > { %v1040_v46 = vsel %vm3393_vm8, %v1035_v18, %v1039_v2  ;;  %v1049_v31 = vrot.slane %v1048_v23, 4  ;;  %v373_v38 = vrot.slane %v371_v30, 7  ;;  %v1081_v44 = vrot.slane %v1079_v29, 5  ;;  %v467_v26 = vld [vmem:[#allocation2 + $0x40] sm:$0xf] }
  0x34   : > { %2847 = vmatpush3.bf16.msra.mxu1 %v3143_v63  ;;  %v3420_v32 = vcombine.low %v1026_v58, %v1040_v46  ;;  %v1063_v35 = vrot.slane %v1062_v28, 4  ;;  %v1076_v43 = vor.u32 %v1075_v34, %v1072_v33  ;;  %v292_v47 = vmax.f32 %v284_v60, 0.0  ;;  %v455_v63 = vld [vmem:[#allocation2 + $0x30] sm:$0xf] }
  0x35   : > { %2848 = vmatprep.subr.bf16.mxu1 %v3145_v17  ;;  %v3428_v42 = vsel %vm3393_vm8, %v1049_v31, %v1053_v13  ;;  %v376_v53 = vor.u32 %v374_v39, %v373_v38  ;;  %v377_v55 = vrot.slane %v373_v38, 4  ;;  %v379_v59 = vshrl.u32 %v2659_v27, 16  ;;  %v470_v38 = vld [vmem:[#allocation2 + $0x44] sm:$0x1]  ;;  %v3152_v39 = vld [vmem:[%s3737_s1 + $0x1d8] sm:$0xff]  }
  0x36   : > { %v2516_v50 = vcombine.low %v1040_v46, %v3428_v42  ;;  %v3436_v16 = vsel %vm3393_vm8, %v1063_v35, %v1067_v20  ;;  %v1077_v56 = vrot.slane %v1076_v43, 4  ;;  %v2660_v58 = vpack.c.bf16 %v292_v47, %v292_v47  ;;  %v464_v20 = vld [vmem:[#allocation2 + $0x3c] sm:$0x1] }
  0x37   : > { %v450_v60 = vsel %vm3340_vm4, %v376_v53, %v449_v45  ;;  %v382_v61 = vshll.u32 %v2659_v27, 16  ;;  %v453_v0 = vsel %vm3349_vm5, %v377_v55, %v452_v49  ;;  %v293_v2 = vmax.f32 %v285_v40, 0.0  ;;  %v3154_v27 = vld [vmem:[%s3737_s1 + $0xf0] sm:$0xff]  }
  0x38   : > { %2849 = vmatpush3.bf16.msra.mxu1 %v3145_v17  ;;  %2932 = vmatprep.mubr.bf16.mxu0 %v2516_v50  ;;  %v3444_v4 = vsel %vm3393_vm8, %v1077_v56, %v1081_v44  ;;  %451 = vst [vmem:[#allocation2 + $0x28] sm:$0xf] %v450_v60  ;;  %v381_v6 = vrot.slane %v379_v59, 7  ;;  %v387_v7 = vshrl.u32 %v2660_v58, 16  ;;  %v390_v8 = vshll.u32 %v2660_v58, 16  ;;  %v3157_v44 = vld [vmem:[%s3737_s1 + $0xf8] sm:$0xff]  }
  0x39   : > { %2850 = vmatprep.subr.bf16.mxu1 %v3147_v37  ;;  %454 = vst [vmem:[#allocation2 + $0x2c] sm:$0x1] %v453_v0  ;;  %v2517_v9 = vcombine.low %v3436_v16, %v3444_v4  ;;  %v2661_v12 = vpack.c.bf16 %v293_v2, %v293_v2  ;;  %v3454_v17 = vld [vmem:[#allocation2 + $0x20] sm:$0xf] }
  0x3a   : > { %v384_v13 = vor.u32 %v382_v61, %v381_v6  ;;  %v385_v14 = vrot.slane %v381_v6, 4  ;;  %v389_v15 = vrot.slane %v387_v7, 7  ;;  %v3156_v56 = vld [vmem:[%s3737_s1 + $0x1e0] sm:$0xff]   ;;  %v2435_v61 = vcombine.low %v3380_v36, %v3387_v41  ;;  %v3158_v36 = vld [vmem:[%s3737_s1 + $0x1e8] sm:$0xff]  }
  0x3b   : > { %2933 = vmatmul.mubr.bf16.vlgmr.msra.gmra.mrb[0].mxu0 %v2517_v9  ;;  %v395_v18 = vshrl.u32 %v2661_v12, 16  ;;  %v398_v19 = vshll.u32 %v2661_v12, 16  ;;  %v3159_v2 = vld [vmem:[%s3737_s1 + $0x180] sm:$0xff]  }
  0x3c   : > { %2851 = vmatpush3.bf16.msra.mxu1 %v3147_v37  ;;  %2941 = vmatpush3.bf16.msra.mxu0 %v3356_v3  ;;  %v392_v22 = vor.u32 %v390_v8, %v389_v15  ;;  %v393_v23 = vrot.slane %v389_v15, 4  ;;  %v456_v24 = vsel %vm3340_vm4, %v384_v13, %v455_v63  ;;  %v459_v25 = vsel %vm3349_vm5, %v385_v14, %v458_v1 }
  0x3d   : > { %2852 = vmatprep.subr.bf16.mxu1 %v3149_v52  ;;  %2942 = vmatprep.subr.bf16.mxu0 %v3148_v5  ;;  %457 = vst [vmem:[#allocation2 + $0x30] sm:$0xf] %v456_v24  ;;  %460 = vst [vmem:[#allocation2 + $0x34] sm:$0x1] %v459_v25  ;;  %v397_v3 = vrot.slane %v395_v18, 7 }
  0x3e   : > { %v462_v46 = vsel %vm3340_vm4, %v392_v22, %v461_v10  ;;  %v465_v28 = vsel %vm3349_vm5, %v393_v23, %v464_v20 }
  0x3f   : > { %v3471_v29 = vld [vmem:[#allocation2 + $0x28] sm:$0xf]  ;;  %463 = vst [vmem:[#allocation2 + $0x38] sm:$0xf] %v462_v46  ;;  %v400_v33 = vor.u32 %v398_v19, %v397_v3  ;;  %466 = vst [vmem:[#allocation2 + $0x3c] sm:$0x1] %v465_v28 }
  0x40   : > { %2853 = vmatpush3.bf16.msra.mxu1 %v3149_v52  ;;  %v1000_v30 = vld [vmem:[#allocation2 + $0x28] sm:$0xf]  ;;  %v1001_v31 = vld [vmem:[#allocation2 + $0x2c] sm:$0x1]  ;;  %2943 = vmatpush3.bf16.msra.mxu0 %v3148_v5  ;;  %v3475_v34 = vcombine.low %v3454_v17, %v3471_v29  ;;  %v401_v40 = vrot.slane %v397_v3, 4  ;;  %v3160_v46 = vld [vmem:[%s3737_s1 + $0x1f0] sm:$0xff]  }
  0x41   : > { %2854 = vmatprep.subr.bf16.mxu1 %v3151_v11  ;;  %v1084_v35 = vshrl.u32 %v1000_v30, 16  ;;  %v1087_v37 = vshll.u32 %v1000_v30, 16  ;;  %2944 = vmatprep.subr.bf16.mxu0 %v3150_v21  ;;  %v468_v43 = vsel %vm3340_vm4, %v400_v33, %v467_v26  ;;  %v1093_v49 = vshll.u32 %v1001_v31, 16  ;;  %v1008_v26 = vld [vmem:[#allocation2 + $0x48] sm:$0xf] }
  0x42   : > { %2840 = vmatprep.mubr.bf16.mxu1 %v3475_v34  ;;  %469 = vst [vmem:[#allocation2 + $0x40] sm:$0xf] %v468_v43  ;;  %v471_v50 = vsel %vm3349_vm5, %v401_v40, %v470_v38 }
  0x43   : > { %v1086_v45 = vrot.slane %v1084_v35, 4  ;;  %v1089_v47 = vrot.slane %v1087_v37, 5  ;;  %472 = vst [vmem:[#allocation2 + $0x44] sm:$0x1] %v471_v50  ;;  %v1095_v63 = vrot.slane %v1093_v49, 5  ;;  %v3161_v35 = vld [vmem:[%s3737_s1 + $0x188] sm:$0xff]  }
  0x44   : > { %2855 = vmatpush3.bf16.msra.mxu1 %v3151_v11  ;;  %2945 = vmatpush3.bf16.msra.mxu0 %v3150_v21  ;;  %v3488_v52 = vld [vmem:[#allocation2 + $0x30] sm:$0xf]  ;;  %v1003_v53 = vld [vmem:[#allocation2 + $0x34] sm:$0x1]  ;;  %v1009_v50 = vld [vmem:[#allocation2 + $0x4c] sm:$0x1] }
  0x45   : > { %2856 = vmatprep.subr.bf16.mxu1 %v3154_v27  ;;  %v1002_v51 = vld [vmem:[#allocation2 + $0x30] sm:$0xf]  ;;  %v1090_v55 = vor.u32 %v1089_v47, %v1086_v45  ;;  %2946 = vmatprep.subr.bf16.mxu0 %v3152_v39  ;;  %v1107_v60 = vshll.u32 %v1003_v53, 16  ;;  %v2437_v37 = vcombine.low %v3471_v29, %v3488_v52  ;;  %v3534_v47 = vcombine.low %v3428_v42, %v3436_v16  ;;  %v3165_v42 = vld [vmem:[%s3737_s1 + $0x198] sm:$0xff]  }
  0x46   : > { %v1098_v58 = vshrl.u32 %v1002_v51, 16  ;;  %v1101_v59 = vshll.u32 %v1002_v51, 16  ;;  %v3495_v57 = vld [vmem:[#allocation2 + $0x38] sm:$0xf]  ;;  %v1005_v8 = vld [vmem:[#allocation2 + $0x3c] sm:$0x1] }
  0x47   : > { %v1004_v0 = vld [vmem:[#allocation2 + $0x38] sm:$0xf]  ;;  %v3499_v1 = vcombine.low %v3488_v52, %v3495_v57  ;;  %v1091_v5 = vrot.slane %v1090_v55, 4  ;;  %v1109_v10 = vrot.slane %v1107_v60, 5  ;;  %v1121_v13 = vshll.u32 %v1005_v8, 16  ;;  %v3163_v29 = vld [vmem:[%s3737_s1 + $0x190] sm:$0xff]  }
  0x48   : > { %2857 = vmatpush3.bf16.msra.mxu1 %v3154_v27  ;;  %v1100_v6 = vrot.slane %v1098_v58, 4  ;;  %v1103_v7 = vrot.slane %v1101_v59, 5  ;;  %2947 = vmatpush3.bf16.msra.mxu0 %v3152_v39  ;;  %v1112_v41 = vshrl.u32 %v1004_v0, 16  ;;  %v1115_v9 = vshll.u32 %v1004_v0, 16  ;;  %v3164_v55 = vld [vmem:[%s3737_s1 + $0x80] sm:$0xff]  }
  0x49   : > { %2858 = vmatprep.subr.bf16.mxu1 %v3157_v44  ;;  %2841 = vmatmul.mubr.bf16.gmra.mrb[4].mxu1 %v3499_v1  ;;  %v1006_v12 = vld [vmem:[#allocation2 + $0x40] sm:$0xf]  ;;  %v1096_v19 = vsel %vm3393_vm8, %v1091_v5, %v1095_v63  ;;  %v2436_v27 = vcombine.low %v3397_v54, %v3454_v17  ;;  %v1123_v28 = vrot.slane %v1121_v13, 5  ;;  %v1473_v54 = vshrl.u32 %v1008_v26, 16  ;;  %v1644_v60 = vld [vmem:[#allocation2 + $0x4] sm:$0x1] }
  0x4a   : > { %2948 = vmatprep.subr.bf16.mxu0 %v3156_v56  ;;  %v1104_v11 = vor.u32 %v1103_v7, %v1100_v6  ;;  %2860 = vmatprep.mubr.bf16.mxu1 %v2435_v61  ;;  %v1114_v14 = vrot.slane %v1112_v41, 4  ;;  %v1117_v15 = vrot.slane %v1115_v9, 5  ;;  %v1296_v18 = vshrl.u32 %v1006_v12, 16  ;;  %v1007_v21 = vld [vmem:[#allocation2 + $0x44] sm:$0x1]  ;;  %v3166_v6 = vld [vmem:[%s3737_s1 + $0x88] sm:$0xff]  }
  0x4b   : > { %v1299_v22 = vshll.u32 %v1006_v12, 16  ;;  %v1305_v25 = vshll.u32 %v1007_v21, 16  ;;  %v1476_v39 = vshll.u32 %v1008_v26, 16  ;;  %v3530_v45 = vld [vmem:[#allocation2 + $0x40] sm:$0xf]  ;;  %v1475_v52 = vrot.slane %v1473_v54, 4 }
  0x4c   : > { %2859 = vmatpush3.bf16.msra.mxu1 %v3157_v44  ;;  %v1105_v20 = vrot.slane %v1104_v11, 4  ;;  %2949 = vmatpush3.bf16.msra.mxu0 %v3156_v56  ;;  %v1118_v23 = vor.u32 %v1117_v15, %v1114_v14  ;;  %v1298_v24 = vrot.slane %v1296_v18, 4  ;;  %v3162_v44 = vld [vmem:[%s3737_s1 + $0x1f8] sm:$0xff]   ;;  %v2438_v56 = vcombine.low %v3495_v57, %v3530_v45  ;;  %v1643_v59 = vld [vmem:[#allocation2] sm:$0xe] }
  0x4d   : > { %2868 = vmatprep.subr.bf16.mxu1 %v3159_v2  ;;  %2950 = vmatprep.subr.bf16.mxu0 %v3158_v36  ;;  %v1301_v30 = vrot.slane %v1299_v22, 5  ;;  %v1307_v38 = vrot.slane %v1305_v25, 5  ;;  %v1478_v51 = vrot.slane %v1476_v39, 5  ;;  %v1482_v16 = vshll.u32 %v1009_v50, 16  ;;  %v3167_v61 = vld [vmem:[%s3737_s1 + $0x1a0] sm:$0xff]   ;;  %v3170_v15 = vld [vmem:[%s3737_s1 + $0x98] sm:$0xff]  }
  0x4e   : > { %v1110_v3 = vsel %vm3393_vm8, %v1105_v20, %v1109_v10  ;;  %v1119_v33 = vrot.slane %v1118_v23, 4  ;;  %v1645_v57 = vld [vmem:[#allocation2 + $0x8] sm:$0xe]  ;;  %v3551_v63 = vcombine.low %v3444_v4, %v1096_v19  ;;  %v1646_v0 = vld [vmem:[#allocation2 + $0xc] sm:$0x1]  ;;  %v2553_v8 = vrot.slane %v1643_v59, 9 }
  0x4f   : > { %v2518_v31 = vcombine.low %v1096_v19, %v1110_v3  ;;  %v1302_v17 = vor.u32 %v1301_v30, %v1298_v24  ;;  %v1479_v58 = vor.u32 %v1478_v51, %v1475_v52  ;;  %v1484_v5 = vrot.slane %v1482_v16, 5  ;;  %v3169_v4 = vld [vmem:[%s3737_s1 + $0x1a8] sm:$0xff]   ;;  %v3168_v10 = vld [vmem:[%s3737_s1 + $0x90] sm:$0xff]   ;;  %v3173_v19 = vld [vmem:[%s3737_s1 + $0x1b8] sm:$0xff]  }
  0x50   : > { %2951 = vmatpush3.bf16.msra.mxu0 %v3158_v36  ;;  %v1124_v40 = vsel %vm3393_vm8, %v1119_v33, %v1123_v28  ;;  %v1684_v36 = vrot.slane %v1644_v60, 5  ;;  %v2554_v41 = vrot.slane %v1645_v57, 9  ;;  %v1688_v9 = vrot.slane %v1646_v0, 5  ;;  %v3172_v20 = vld [vmem:[%s3737_s1 + $0xa0] sm:$0xff]   ;;  %v3174_v22 = vld [vmem:[%s3737_s1 + $0xa8] sm:$0xff]   ;;  %v3176_v23 = vld [vmem:[%s3737_s1 + $0xb0] sm:$0xff]  }
  0x51   : > { %2936 = vmatprep.mubr.bf16.mxu0 %v2518_v31  ;;  %2861 = vmatmul.mubr.bf16.vlgmr.msra.gmra.mrb[0].mxu1 %v2436_v27  ;;  %v1303_v43 = vrot.slane %v1302_v17, 4  ;;  %v3557_v7 = vcombine.low %v1110_v3, %v1124_v40  ;;  %v3175_v21 = vld [vmem:[%s3737_s1 + $0x40] sm:$0xff]   ;;  %v3177_v24 = vld [vmem:[%s3737_s1 + $0x48] sm:$0xff]   ;;  %v1647_v25 = vld [vmem:[#allocation2 + $0x10] sm:$0xe] }
  0x52   : > { %2952 = vmatprep.subr.bf16.mxu0 %v3160_v46  ;;  %2869 = vmatpush3.bf16.msra.mxu1 %v3159_v2  ;;  %v1480_v2 = vrot.slane %v1479_v58, 4  ;;  %v1685_v12 = vsel %vm3562_vm11, %v2553_v8, %v1684_v36  ;;  %v3579_v13 = vsel %vm3562_vm11, %v2554_v41, %v1688_v9  ;;  %v1648_v26 = vld [vmem:[#allocation2 + $0x14] sm:$0x1]  ;;  %v1649_v27 = vld [vmem:[#allocation2 + $0x18] sm:$0xe]  ;;  %v3183_v58 = vld [vmem:[%s3737_s1 + $0x60] sm:$0xff]  }
  0x53   : > { %2864 = vmatprep.mubr.bf16.mxu1 %v2437_v37  ;;  %v1308_v49 = vsel %vm3393_vm8, %v1303_v43, %v1307_v38  ;;  %2870 = vmatprep.subr.bf16.mxu1 %v3161_v35  ;;  %v2577_v18 = vcombine.low %v1685_v12, %v3579_v13  ;;  %v1650_v3 = vld [vmem:[#allocation2 + $0x1c] sm:$0x1]  ;;  %v1651_v28 = vld [vmem:[#allocation2 + $0x20] sm:$0xe]  ;;  %v1652_v30 = vld [vmem:[#allocation2 + $0x24] sm:$0x1] }
  0x54   : > { %v2519_v53 = vcombine.low %v1124_v40, %v1308_v49  ;;  %2953 = vmatpush3.bf16.msra.mxu0 %v3160_v46  ;;  %v1485_v11 = vsel %vm3393_vm8, %v1480_v2, %v1484_v5  ;;  %v490_v46 = vld [vmem:[#allocation2 + $0x48] sm:$0xf]  ;;  %v1654_v33 = vld [vmem:[#allocation2 + $0x2c] sm:$0x1]  ;;  %v2555_v37 = vrot.slane %v1647_v25, 9  ;;  %v1692_v54 = vrot.slane %v1648_v26, 5 }
  0x55   : > { %2954 = vmatprep.subr.bf16.mxu0 %v3162_v44  ;;  %v2544_v14 = vcombine.low %v1308_v49, %v1485_v11  ;;  %v1653_v31 = vld [vmem:[#allocation2 + $0x28] sm:$0xe]  ;;  %v2556_v17 = vrot.slane %v1649_v27, 9  ;;  %v1696_v38 = vrot.slane %v1650_v3, 5  ;;  %v2557_v39 = vrot.slane %v1651_v28, 9  ;;  %v3184_v8 = vld [vmem:[%s3737_s1 + $0x150] sm:$0xff]  }
  0x56   : > { %2937 = vmatmul.mubr.bf16.gmra.mrb[4].mxu0 %v2519_v53  ;;  %2871 = vmatpush3.bf16.msra.mxu1 %v3161_v35  ;;  %v3179_v35 = vld [vmem:[%s3737_s1 + $0x50] sm:$0xff]   ;;  %v1700_v40 = vrot.slane %v1652_v30, 5  ;;  %v2558_v43 = vrot.slane %v1653_v31, 9  ;;  %v1693_v49 = vsel %vm3562_vm11, %v2555_v37, %v1692_v54  ;;  %v1657_v53 = vld [vmem:[#allocation2 + $0x38] sm:$0xe]  ;;  %v3182_v0 = vld [vmem:[%s3737_s1 + $0x148] sm:$0xff]  }
  0x57   : > { %2872 = vmatprep.subr.bf16.mxu1 %v3163_v29  ;;  %2956 = vmatprep.mubr.bf16.mxu0 %v3534_v47  ;;  %v3622_v50 = vsel %vm3562_vm11, %v2556_v17, %v1696_v38  ;;  %v1655_v52 = vld [vmem:[#allocation2 + $0x30] sm:$0xe]  ;;  %v1656_v51 = vld [vmem:[#allocation2 + $0x34] sm:$0x1]  ;;  %v3186_v9 = vld [vmem:[%s3737_s1 + $0x158] sm:$0xff]  }
  0x58   : > { %2955 = vmatpush3.bf16.msra.mxu0 %v3162_v44  ;;  %v1704_v44 = vrot.slane %v1654_v33, 5  ;;  %v3636_v16 = vcombine.low %v1693_v49, %v3622_v50  ;;  %v2559_v59 = vrot.slane %v1655_v52, 9  ;;  %v1708_v60 = vrot.slane %v1656_v51, 5  ;;  %v3188_v41 = vld [vmem:[%s3737_s1 + $0x70] sm:$0xff]   ;;  %v3190_v11 = vld [vmem:[%s3737_s1 + $0x78] sm:$0xff]   ;;  %v3192_v12 = vld [vmem:[%s3737_s1 + $0x200] sm:$0xff]  }
  0x59   : > { %2964 = vmatprep.subr.bf16.mxu0 %v3164_v55  ;;  %2865 = vmatmul.mubr.bf16.gmra.mrb[4].mxu1 %v2438_v56  ;;  %v3629_v56 = vsel %vm3562_vm11, %v2557_v39, %v1700_v40  ;;  %v3199_v25 = vld [vmem:[%s3737_s1 + $0x228] sm:$0xff]   ;;  %v3201_v31 = vld [vmem:[%s3737_s1 + $0x238] sm:$0xff]  }
  0x5a   : > { %2873 = vmatpush3.bf16.msra.mxu1 %v3163_v29  ;;  %2884 = vmatprep.mubr.bf16.mxu1 %v3408_v62  ;;  %v3180_v29 = vld [vmem:[%s3737_s1 + $0x140] sm:$0xff]   ;;  %v1709_v5 = vsel %vm3562_vm11, %v2559_v59, %v1708_v60  ;;  %v1661_v27 = vld [vmem:[#allocation2 + $0x48] sm:$0xe]  ;;  %v1662_v3 = vld [vmem:[#allocation2 + $0x4c] sm:$0x1] }
  0x5b   : > { %2874 = vmatprep.subr.bf16.mxu1 %v3165_v42  ;;  %v2618_v28 = vrot.slane %v1661_v27, 9  ;;  %v2057_v30 = vrot.slane %v1662_v3, 5 }
  0x5d   : > { %v2058_v33 = vsel %vm3562_vm11, %v2618_v28, %v2057_v30 }
  0x5e   : > { %2957 = vmatmul.mubr.bf16.vlgmr.msra.gmra.mrb[0].mxu0 %v3551_v63  ;;  %2875 = vmatpush3.bf16.msra.mxu1 %v3165_v42  ;;  %v3633_v42 = vsel %vm3562_vm11, %v2558_v43, %v1704_v44 }
  0x5f   : > { %2965 = vmatpush3.bf16.msra.mxu0 %v3164_v55  ;;  %2876 = vmatprep.subr.bf16.mxu1 %v3167_v61  ;;  %v1658_v55 = vld [vmem:[#allocation2 + $0x3c] sm:$0x1]  ;;  %v3647_v2 = vcombine.low %v3629_v56, %v3633_v42 }
  0x60   : > { %2966 = vmatprep.subr.bf16.mxu0 %v3166_v6  ;;  %2960 = vmatprep.mubr.bf16.mxu0 %v3557_v7  ;;  %v1712_v57 = vrot.slane %v1658_v55, 5 }
  0x62   : > { %2877 = vmatpush3.bf16.msra.mxu1 %v3167_v61  ;;  %v2560_v61 = vrot.slane %v1657_v53, 9 }
  0x63   : > { %2967 = vmatpush3.bf16.msra.mxu0 %v3166_v6  ;;  %2878 = vmatprep.subr.bf16.mxu1 %v3169_v4 }
  0x64   : > { %2968 = vmatprep.subr.bf16.mxu0 %v3168_v10  ;;  %v3657_v6 = vsel %vm3562_vm11, %v2560_v61, %v1712_v57 }
  0x65   : > { %v2580_v36 = vcombine.low %v1709_v5, %v3657_v6 }
  0x66   : > { %2879 = vmatpush3.bf16.msra.mxu1 %v3169_v4  ;;  %2961 = vmatmul.mubr.bf16.gmra.mrb[4].mxu0 %v2544_v14  ;;  %v2606_v4 = vcombine.low %v3579_v13, %v1693_v49  ;;  %v3191_v13 = vld [vmem:[%s3737_s1 + $0x168] sm:$0xff]  }
  0x67   : > { %2969 = vmatpush3.bf16.msra.mxu0 %v3168_v10  ;;  %2880 = vmatprep.subr.bf16.mxu1 %v3171_v48  ;;  %v3189_v10 = vld [vmem:[%s3737_s1 + $0x160] sm:$0xff]   ;;  %v3194_v14 = vld [vmem:[%s3737_s1 + $0x208] sm:$0xff]  }
  0x68   : > { %2970 = vmatprep.subr.bf16.mxu0 %v3170_v15  ;;  %2980 = vmatprep.mubr.bf16.mxu0 %v2577_v18  ;;  %v3195_v18 = vld [vmem:[%s3737_s1 + $0x178] sm:$0xff]  }
  0x6a   : > { %2881 = vmatpush3.bf16.msra.mxu1 %v3171_v48  ;;  %v3193_v48 = vld [vmem:[%s3737_s1 + $0x170] sm:$0xff]  }
  0x6b   : > { %2971 = vmatpush3.bf16.msra.mxu0 %v3170_v15  ;;  %2882 = vmatprep.subr.bf16.mxu1 %v3173_v19  ;;  %v3196_v15 = vld [vmem:[%s3737_s1 + $0x210] sm:$0xff]  }
  0x6c   : > { %2972 = vmatprep.subr.bf16.mxu0 %v3172_v20 }
  0x6e   : > { %2883 = vmatpush3.bf16.msra.mxu1 %v3173_v19  ;;  %v1660_v19 = vld [vmem:[#allocation2 + $0x44] sm:$0x1] }
  0x6f   : > { %2973 = vmatpush3.bf16.msra.mxu0 %v3172_v20  ;;  %2892 = vmatprep.subr.bf16.mxu1 %v3175_v21  ;;  %v2607_v20 = vcombine.low %v3622_v50, %v3629_v56 }
  0x70   : > { %2974 = vmatprep.subr.bf16.mxu0 %v3174_v22 }
  0x71   : > { %2885 = vmatmul.mubr.bf16.vlgmr.msra.gmra.mrb[0].mxu1 %v3475_v34  ;;  %v3178_v34 = vld [vmem:[%s3737_s1 + $0xb8] sm:$0xff]  }
  0x72   : > { %2893 = vmatpush3.bf16.msra.mxu1 %v3175_v21  ;;  %2888 = vmatprep.mubr.bf16.mxu1 %v3499_v1  ;;  %v2463_v1 = vcombine.low %v3530_v45, %v490_v46  ;;  %v3181_v45 = vld [vmem:[%s3737_s1 + $0x58] sm:$0xff]   ;;  %v2608_v21 = vcombine.low %v3633_v42, %v1709_v5  ;;  %v3200_v46 = vld [vmem:[%s3737_s1 + $0x230] sm:$0xff]  }
  0x73   : > { %2975 = vmatpush3.bf16.msra.mxu0 %v3174_v22  ;;  %2894 = vmatprep.subr.bf16.mxu1 %v3177_v24 }
  0x74   : > { %2976 = vmatprep.subr.bf16.mxu0 %v3176_v23 }
  0x76   : > { %2895 = vmatpush3.bf16.msra.mxu1 %v3177_v24  ;;  %v3198_v24 = vld [vmem:[%s3737_s1 + $0x220] sm:$0xff]  }
  0x77   : > { %2977 = vmatpush3.bf16.msra.mxu0 %v3176_v23  ;;  %2896 = vmatprep.subr.bf16.mxu1 %v3179_v35  ;;  %v1888_v23 = vrot.slane %v1660_v19, 5 }
  0x78   : > { %2978 = vmatprep.subr.bf16.mxu0 %v3178_v34 }
  0x79   : > { %2889 = vmatmul.mubr.bf16.gmra.mrb[4].mxu1 %v2463_v1 }
  0x7a   : > { %2897 = vmatpush3.bf16.msra.mxu1 %v3179_v35  ;;  %2908 = vmatprep.mubr.bf16.mxu1 %v3420_v32  ;;  %v3185_v32 = vld [vmem:[%s3737_s1 + $0x68] sm:$0xff]  }
  0x7b   : > { %2979 = vmatpush3.bf16.msra.mxu0 %v3178_v34  ;;  %2898 = vmatprep.subr.bf16.mxu1 %v3181_v45 }
  0x7c   : > { %2988 = vmatprep.subr.bf16.mxu0 %v3180_v29 }
  0x7e   : > { %2981 = vmatmul.mubr.bf16.vlgmr.msra.gmra.mrb[0].mxu0 %v3636_v16  ;;  %2899 = vmatpush3.bf16.msra.mxu1 %v3181_v45 }
  0x7f   : > { %2989 = vmatpush3.bf16.msra.mxu0 %v3180_v29  ;;  %2900 = vmatprep.subr.bf16.mxu1 %v3183_v58 }
  0x80   : > { %2990 = vmatprep.subr.bf16.mxu0 %v3182_v0  ;;  %2984 = vmatprep.mubr.bf16.mxu0 %v3647_v2 }
  0x82   : > { %2901 = vmatpush3.bf16.msra.mxu1 %v3183_v58 }
  0x83   : > { %2991 = vmatpush3.bf16.msra.mxu0 %v3182_v0  ;;  %2902 = vmatprep.subr.bf16.mxu1 %v3185_v32 }
  0x84   : > { %2992 = vmatprep.subr.bf16.mxu0 %v3184_v8 }
  0x86   : > { %2903 = vmatpush3.bf16.msra.mxu1 %v3185_v32  ;;  %2985 = vmatmul.mubr.bf16.gmra.mrb[4].mxu0 %v2580_v36 }
  0x87   : > { %2993 = vmatpush3.bf16.msra.mxu0 %v3184_v8  ;;  %2904 = vmatprep.subr.bf16.mxu1 %v3188_v41 }
  0x88   : > { %2994 = vmatprep.subr.bf16.mxu0 %v3186_v9  ;;  %3004 = vmatprep.mubr.bf16.mxu0 %v2606_v4 }
  0x8a   : > { %2905 = vmatpush3.bf16.msra.mxu1 %v3188_v41 }
  0x8b   : > { %2995 = vmatpush3.bf16.msra.mxu0 %v3186_v9  ;;  %2906 = vmatprep.subr.bf16.mxu1 %v3190_v11 }
  0x8c   : > { %2996 = vmatprep.subr.bf16.mxu0 %v3189_v10 }
  0x8e   : > { %2907 = vmatpush3.bf16.msra.mxu1 %v3190_v11 }
  0x8f   : > { %2997 = vmatpush3.bf16.msra.mxu0 %v3189_v10  ;;  %3036 = vmatprep.subr.bf16.mxu1 %v3192_v12 }
  0x90   : > { %2998 = vmatprep.subr.bf16.mxu0 %v3191_v13 }
  0x91   : > { %2909 = vmatmul.mubr.bf16.vlgmr.msra.gmra.mrb[0].mxu1 %v3534_v47  ;;  %v3197_v47 = vld [vmem:[%s3737_s1 + $0x218] sm:$0xff]  }
  0x92   : > { %3044 = vmatpush3.bf16.msra.mxu1 %v3192_v12  ;;  %2912 = vmatprep.mubr.bf16.mxu1 %v3551_v63  ;;  %v1659_v63 = vld [vmem:[#allocation2 + $0x40] sm:$0xe] }
  0x93   : > { %2999 = vmatpush3.bf16.msra.mxu0 %v3191_v13  ;;  %3037 = vmatprep.subr.bf16.mxu1 %v3194_v14  ;;  %v2589_v22 = vrot.slane %v1659_v63, 9 }
  0x94   : > { %3000 = vmatprep.subr.bf16.mxu0 %v3193_v48 }
  0x96   : > { %3045 = vmatpush3.bf16.msra.mxu1 %v3194_v14 }
  0x97   : > { %3001 = vmatpush3.bf16.msra.mxu0 %v3193_v48  ;;  %3038 = vmatprep.subr.bf16.mxu1 %v3196_v15 }
  0x98   : > { %3002 = vmatprep.subr.bf16.mxu0 %v3195_v18 }
  0x99   : > { %2913 = vmatmul.mubr.bf16.gmra.mrb[4].mxu1 %v3557_v7  ;;  %v1889_v7 = vsel %vm3562_vm11, %v2589_v22, %v1888_v23 }
  0x9a   : > { %3046 = vmatpush3.bf16.msra.mxu1 %v3196_v15  ;;  %3032 = vmatprep.mubr.bf16.mxu1 %v2580_v36  ;;  %v2609_v26 = vcombine.low %v3657_v6, %v1889_v7  ;;  %v2635_v35 = vcombine.low %v1889_v7, %v2058_v33 }
  0x9b   : > { %3003 = vmatpush3.bf16.msra.mxu0 %v3195_v18  ;;  %3039 = vmatprep.subr.bf16.mxu1 %v3197_v47 }
  0x9c   : > { %3012 = vmatprep.subr.bf16.mxu0 %v3192_v12 }
  0x9e   : > { %3005 = vmatmul.mubr.bf16.vlgmr.msra.gmra.mrb[0].mxu0 %v2607_v20  ;;  %3047 = vmatpush3.bf16.msra.mxu1 %v3197_v47 }
  0x9f   : > { %3013 = vmatpush3.bf16.msra.mxu0 %v3192_v12  ;;  %3008 = vmatprep.mubr.bf16.mxu0 %v2608_v21 }
  0xa0   : > { %3014 = vmatprep.subr.bf16.mxu0 %v3194_v14  ;;  %3040 = vmatprep.subr.bf16.mxu1 %v3198_v24 }
  0xa2   : > { %3048 = vmatpush3.bf16.msra.mxu1 %v3198_v24 }
  0xa3   : > { %3015 = vmatpush3.bf16.msra.mxu0 %v3194_v14  ;;  %3041 = vmatprep.subr.bf16.mxu1 %v3199_v25 }
  0xa4   : > { %3016 = vmatprep.subr.bf16.mxu0 %v3196_v15 }
  0xa6   : > { %3009 = vmatmul.mubr.bf16.gmra.mrb[4].mxu0 %v2609_v26  ;;  %3049 = vmatpush3.bf16.msra.mxu1 %v3199_v25 }
  0xa7   : > { %3017 = vmatpush3.bf16.msra.mxu0 %v3196_v15  ;;  %3042 = vmatprep.subr.bf16.mxu1 %v3200_v46 }
  0xa8   : > { %3018 = vmatprep.subr.bf16.mxu0 %v3197_v47  ;;  %3028 = vmatprep.mubr.bf16.mxu0 %v3636_v16 }
  0xaa   : > { %3050 = vmatpush3.bf16.msra.mxu1 %v3200_v46 }
  0xab   : > { %3019 = vmatpush3.bf16.msra.mxu0 %v3197_v47  ;;  %3043 = vmatprep.subr.bf16.mxu1 %v3201_v31 }
  0xac   : > { %3020 = vmatprep.subr.bf16.mxu0 %v3198_v24 }
  0xae   : > { %3051 = vmatpush3.bf16.msra.mxu1 %v3201_v31 }
  0xaf   : > { %3021 = vmatpush3.bf16.msra.mxu0 %v3198_v24 }
  0xb0   : > { %3022 = vmatprep.subr.bf16.mxu0 %v3199_v25 }
  0xb1   : > { %3033 = vmatmul.mubr.bf16.vlgmr.msra.gmra.mrb[8].mxu1 %v2635_v35 }
  0xb3   : > { %3023 = vmatpush3.bf16.msra.mxu0 %v3199_v25 }
  0xb4   : > { %3024 = vmatprep.subr.bf16.mxu0 %v3200_v46 }
  0xb7   : > { %3025 = vmatpush3.bf16.msra.mxu0 %v3200_v46 }
  0xb8   : > { %3026 = vmatprep.subr.bf16.mxu0 %v3201_v31 }
  0xbb   : > { %3027 = vmatpush3.bf16.msra.mxu0 %v3201_v31 }
  0xbe   : > { %3029 = vmatmul.mubr.bf16.vlgmr.msra.gmra.mrb[0].mxu0 %v3647_v2 }
 0x164   : > { %v2910_v37 = vpop.f32.mrb[0].mxu1 }
 0x165   : > { %v1248_v54 = vpop.f32.mrb[1].mxu1 }
 0x166   : > { %v2911_v62 = vpop.f32.mrb[2].mxu1 }
 0x167   : > { %v1251_v17 = vpop.f32.mrb[3].mxu1 }
 0x16c   : > { %v2914_v38 = vpop.f32.mrb[4].mxu1 }
 0x16d   : > { %v1264_v34 = vpop.f32.mrb[5].mxu1 }
 0x16e   : > { %v2915_v1 = vpop.f32.mrb[6].mxu1 }
 0x16f   : > { %v1267_v39 = vpop.f32.mrb[7].mxu1 }
 0x179   : > { %v3010_v40 = vpop.f32.mrb[4].mxu0 }
 0x17a   : > { %v3056_v43 = vadd.f32 %v3010_v40, %v2914_v38  ;;  %v2022_v44 = vpop.f32.mrb[5].mxu0 }
 0x17b   : > { %v3058_v29 = vadd.f32 %v2022_v44, %v1264_v34  ;;  %v3011_v49 = vpop.f32.mrb[6].mxu0 }
 0x17c   : > { %v3060_v50 = vadd.f32 %v3011_v49, %v2915_v1  ;;  %v2025_v45 = vpop.f32.mrb[7].mxu0 }
 0x17d   : > { %v3062_v52 = vadd.f32 %v2025_v45, %v1267_v39 }
 0x184   : > { %v3034_v51 = vpop.f32.mrb[8].mxu1 }
 0x185   : > { %v3057_v53 = vadd.f32 %v3056_v43, %v3034_v51  ;;  %v2185_v55 = vpop.f32.mrb[9].mxu1 }
 0x186   : > { %v3059_v56 = vadd.f32 %v3058_v29, %v2185_v55  ;;  %v3035_v42 = vpop.f32.mrb[10].mxu1 }
 0x187   : > { %v3061_v16 = vadd.f32 %v3060_v50, %v3035_v42  ;;  %v2188_v58 = vpop.f32.mrb[11].mxu1  ;;  %v2284_v23 = vmul.f32 %v3057_v53, %v3057_v53 }
 0x188   : > { %v3063_v59 = vadd.f32 %v3062_v52, %v2188_v58  ;;  %v2282_v47 = vmul.f32 %v3059_v56, %v3059_v56 }
 0x189   : > { %v2704_v60 = vpack.c.bf16 %v3061_v16, %v3057_v53  ;;  %v2285_v25 = vmul.f32 %v3061_v16, %v3061_v16 }
 0x18a   : > { %v2699_v61 = vpack.c.bf16 %v3063_v59, %v3059_v56  ;;  %v2283_v20 = vmul.f32 %v3063_v59, %v3063_v59 }
 0x18b   : > { %2711 = vst [vmem:[%s233_s28 + $0x18] sm:$0xff] %v2704_v60  }
 0x18c   : > { %2710 = vst [vmem:[%s233_s28 + $0x10] sm:$0xff] %v2699_v61  }
 0x191   : > { %v3030_v57 = vpop.f32.mrb[0].mxu0 }
 0x192   : > { %v3052_v0 = vadd.f32 %v3030_v57, %v2910_v37  ;;  %v2169_v2 = vpop.f32.mrb[1].mxu0 }
 0x193   : > { %v3053_v32 = vadd.f32 %v2169_v2, %v1248_v54  ;;  %v3031_v5 = vpop.f32.mrb[2].mxu0 }
 0x194   : > { %v3054_v6 = vadd.f32 %v3031_v5, %v2911_v62  ;;  %v2172_v8 = vpop.f32.mrb[3].mxu0  ;;  %v2280_v12 = vmul.f32 %v3052_v0, %v3052_v0 }
 0x195   : > { %v3055_v36 = vadd.f32 %v2172_v8, %v1251_v17  ;;  %v2278_v9 = vmul.f32 %v3053_v32, %v3053_v32 }
 0x196   : > { %v2694_v41 = vpack.c.bf16 %v3054_v6, %v3052_v0  ;;  %v2281_v48 = vmul.f32 %v3054_v6, %v3054_v6 }
 0x197   : > { %v2689_v4 = vpack.c.bf16 %v3055_v36, %v3053_v32  ;;  %v2264_v11 = vadd.f32 %v3055_v36, %v3053_v32  ;;  %v2279_v10 = vmul.f32 %v3055_v36, %v3055_v36 }
 0x198   : > { %2709 = vst [vmem:[%s233_s28 + $0x8] sm:$0xff] %v2694_v41  }
 0x199   : > { %2690 = vst [vmem:[%s233_s28] sm:$0xff] %v2689_v4   ;;  %v2265_v13 = vadd.f32 %v3052_v0, %v2264_v11  ;;  %v2286_v14 = vadd.f32 %v2279_v10, %v2278_v9 }
 0x19b   : > { %v2266_v15 = vadd.f32 %v3054_v6, %v2265_v13  ;;  %v2287_v18 = vadd.f32 %v2286_v14, %v2280_v12 }
 0x19d   : > { %v2267_v63 = vadd.f32 %v3059_v56, %v2266_v15  ;;  %v2288_v19 = vadd.f32 %v2287_v18, %v2281_v48 }
 0x19f   : > { %v2268_v21 = vadd.f32 %v3063_v59, %v2267_v63  ;;  %v2289_v22 = vadd.f32 %v2288_v19, %v2282_v47 }
 0x1a1   : > { %v2269_v24 = vadd.f32 %v3057_v53, %v2268_v21  ;;  %v2290_v7 = vadd.f32 %v2289_v22, %v2283_v20 }
 0x1a3   : > { %v2270_v26 = vadd.f32 %v3061_v16, %v2269_v24  ;;  %v2291_v27 = vadd.f32 %v2290_v7, %v2284_v23 }
 0x1a5   : > { %v2271_v3 = vrot.slane %v2270_v26, 4  ;;  %v2292_v46 = vadd.f32 %v2291_v27, %v2285_v25 }
 0x1a7   : > { %v2272_v28 = vadd.f32 %v2271_v3, %v2270_v26  ;;  %v2293_v30 = vrot.slane %v2292_v46, 4 }
 0x1a9   : > { %v2273_v31 = vrot.slane %v2272_v28, 2  ;;  %v2294_v33 = vadd.f32 %v2293_v30, %v2292_v46 }
 0x1ab   : > { %v2274_v35 = vadd.f32 %v2273_v31, %v2272_v28  ;;  %v2295_v37 = vrot.slane %v2294_v33, 2 }
 0x1ad   : > { %v2275_v54 = vrot.slane %v2274_v35, 1  ;;  %v2296_v62 = vadd.f32 %v2295_v37, %v2294_v33 }
 0x1af   : > { %v2276_v17 = vadd.f32 %v2275_v54, %v2274_v35  ;;  %v2297_v38 = vrot.slane %v2296_v62, 1 }
 0x1b1   : > { %2277 = vst [vmem:[%s238_s30] sm:$0x1] %v2276_v17  ;;  %v2298_v34 = vadd.f32 %v2297_v38, %v2296_v62 }
 0x1b3   : > { %2299 = vst [vmem:[%s238_s30 + $0x1] sm:$0x1] %v2298_v34 }
 0x1b4 PF: > { %s16_s18 = sadd.s32 1, %s3208_s18  }
 0x1b5   : > { %p13_p5 = scmp.ge.s32.totalorder %s16_s18, 4  }
 0x1b7   :  { %15 = sbr.rel (!%p13_p5) target bundleno = 1 (0x1), region = 87 }

</bundles_post_ra>
